<compile_context>
chip_gen: v5e
topology: v5e:2x2
jax: 0.10.0
libtpu: 0.0.40
codegen_flags: <defaults>
</compile_context>

<pallas_src>
import numpy as np
import jax
import jax.numpy as jnp
from jax.experimental import pallas as pl
from jax.experimental.pallas import tpu as pltpu


B, S, C, KS = 4, 16, 8, 9          # batch, seq_len, input_size(=hid_size), kernel_size
C3 = 3 * C
SLAB_LANES = 128


# ---------------------------------------------------------------------------
# series_decomp moving average (replicate padding, kernel=9, stride=1) as a
# static (S, S) averaging matrix.
# ---------------------------------------------------------------------------
def build_avg_matrix(S, kernel_size):
    half = (kernel_size - 1) // 2
    A = np.zeros((S, S), np.float32)
    for t in range(S):
        for d in range(kernel_size):
            s = min(max(t + d - half, 0), S - 1)
            A[t, s] += 1.0 / kernel_size
    return A


# ---------------------------------------------------------------------------
# Parameters (deterministic, shapes from the module's __init__)
# ---------------------------------------------------------------------------
def init_params(key, S, C):
    ks = jax.random.split(key, 13)
    sc = 0.1
    p = {}
    # GRUBlock (input_size=C, hid_size=C)
    p["h0"] = jax.random.normal(ks[0], (1, 1, C), jnp.float32)
    p["w_ih"] = sc * jax.random.normal(ks[1], (3 * C, C), jnp.float32)
    p["w_hh"] = sc * jax.random.normal(ks[2], (3 * C, C), jnp.float32)
    p["b_ih"] = sc * jax.random.normal(ks[3], (3 * C,), jnp.float32)
    p["b_hh"] = sc * jax.random.normal(ks[4], (3 * C,), jnp.float32)
    # TemporalAttn: Linear(C,C) (seq_len != hid_len default) + MHA(embed_dim=S, 1 head)
    p["w0"] = sc * jax.random.normal(ks[5], (C, C), jnp.float32)
    p["b0"] = sc * jax.random.normal(ks[6], (C,), jnp.float32)
    p["in_proj_w"] = sc * jax.random.normal(ks[7], (3 * S, S), jnp.float32)
    p["in_proj_b"] = sc * jax.random.normal(ks[8], (3 * S,), jnp.float32)
    p["out_proj_w"] = sc * jax.random.normal(ks[9], (S, S), jnp.float32)
    p["out_proj_b"] = sc * jax.random.normal(ks[10], (S,), jnp.float32)
    # Model.proj: Linear(2C, C)
    p["wp"] = sc * jax.random.normal(ks[11], (C, 2 * C), jnp.float32)
    p["bp"] = sc * jax.random.normal(ks[12], (C,), jnp.float32)
    return p


# ---------------------------------------------------------------------------
# Pack every weight / bias into ONE (rows, 128) f32 slab.
# Layouts used by the kernel:
#   "sb"  = (S, B*C)   rows = time step s, lanes = (batch, channel)
#   "cs"  = (B*C, S)   rows = (batch, channel), lanes = time step s
# Block-diagonal (kron with I_B) weights make every per-batch matmul a single
# batched matmul.  Biases are pre-tiled to their full broadcast shapes.
# ---------------------------------------------------------------------------
def pack_weight_slab(p, A):
    eyeB = np.eye(B, dtype=np.float32)

    w_ih = np.asarray(p["w_ih"], np.float32)
    w_hh = np.asarray(p["w_hh"], np.float32)
    b_ih = np.asarray(p["b_ih"], np.float32)
    b_hh = np.asarray(p["b_hh"], np.float32)
    h0 = np.asarray(p["h0"], np.float32).reshape(C)
    w0 = np.asarray(p["w0"], np.float32)
    b0 = np.asarray(p["b0"], np.float32)
    ipw = np.asarray(p["in_proj_w"], np.float32)
    ipb = np.asarray(p["in_proj_b"], np.float32)
    opw = np.asarray(p["out_proj_w"], np.float32)
    opb = np.asarray(p["out_proj_b"], np.float32)
    wp = np.asarray(p["wp"], np.float32)
    bp = np.asarray(p["bp"], np.float32)

    entries = [
        # name       array                                              shape
        ("avg",      A),                                                # (S, S)
        ("wih_bd",   np.kron(eyeB, w_ih.T)),                            # (B*C, B*3C)
        ("bih_sb",   np.tile(np.tile(b_ih, B)[None, :], (S, 1))),       # (S, B*3C)
        ("whh_t",    w_hh.T),                                           # (C, 3C)
        ("bhh_sb",   np.tile(b_hh[None, :], (S, 1))),                   # (S, 3C)
        ("h0_sb",    np.tile(h0[None, :], (S, 1))),                     # (S, C)
        ("w0_bd",    np.kron(eyeB, w0)),                                # (B*C, B*C)
        ("b0_cs",    np.tile(np.tile(b0, B)[:, None], (1, S))),         # (B*C, S)
        ("wqkv_t",   ipw.T),                                            # (S, 3S)
        ("bqkv_cs",  np.tile(ipb[None, :], (B * C, 1))),                # (B*C, 3S)
        ("wo_t",     opw.T),                                            # (S, S)
        ("bo_cs",    np.tile(opb[None, :], (B * C, 1))),                # (B*C, S)
        ("mask",     np.where(np.kron(eyeB, np.ones((C, C), np.float32)) > 0.5,
                              np.float32(0.0), np.float32(-1e9))),      # (B*C, B*C)
        ("kps",      np.kron(eyeB, wp[:, 0:C].T)),                      # (B*C, B*C)
        ("kpt",      np.kron(eyeB, wp[:, C:2 * C].T)),                  # (B*C, B*C)
        ("bp_sb",    np.tile(np.tile(bp, B)[None, :], (S, 1))),         # (S, B*C)
    ]

    offsets = {}
    row = 0
    for name, arr in entries:
        h, w = arr.shape
        assert w <= SLAB_LANES
        offsets[name] = (row, h, w)
        row += ((h + 7) // 8) * 8                      # keep row offsets 8-aligned
    slab = np.zeros((row, SLAB_LANES), np.float32)
    for name, arr in entries:
        r0, h, w = offsets[name]
        slab[r0:r0 + h, 0:w] = arr
    return jnp.asarray(slab), offsets


# ---------------------------------------------------------------------------
# Fully-fused Model.forward (block_num = 1) — one pallas_call, one grid point.
# ---------------------------------------------------------------------------
def model_forward(x, slab, offsets):
    assert x.shape == (B, S, C)
    inv_sqrt_s = float(1.0 / np.sqrt(S))               # MHA scale, 1 head, embed_dim=S

    def kernel(x_ref, slab_ref, out_ref, trend_scr):
        f32 = jnp.float32

        def W(name):
            r0, h, w = offsets[name]
            return slab_ref[r0:r0 + h, 0:w]            # static slice of the weight slab

        # ---- assemble the (S, B*C) "sb" view of x (pure block placement) ----
        x_sb = jnp.concatenate(
            [x_ref[b * S:(b + 1) * S, :].astype(f32) for b in range(B)], axis=1)   # (S, B*C)

        # ---- series_decomp: ONE (S,S) x (S,B*C) matmul ----
        trend_sb = jnp.dot(W("avg"), x_sb, preferred_element_type=f32)              # (S, B*C)
        seasonal_sb = x_sb - trend_sb

        # ---- GRU trend branch (recurrence over the PyTorch "time" = batch axis) ----
        gi_all = jnp.dot(trend_sb, W("wih_bd"), preferred_element_type=f32) + W("bih_sb")  # (S, B*3C)
        whh_t = W("whh_t")                              # (C, 3C)   fused r|z|n gate weights
        bhh = W("bhh_sb")                               # (S, 3C)
        h = W("h0_sb")                                  # (S, C)
        for t in range(B):                              # short, static unrolled recurrence
            gi = gi_all[:, t * C3:(t + 1) * C3]         # (S, 3C) static lane slice
            gh = jnp.dot(h, whh_t, preferred_element_type=f32) + bhh
            r = jax.nn.sigmoid(gi[:, 0:C] + gh[:, 0:C])
            z = jax.nn.sigmoid(gi[:, C:2 * C] + gh[:, C:2 * C])
            n = jnp.tanh(gi[:, 2 * C:3 * C] + r * gh[:, 2 * C:3 * C])
            h = (1.0 - z) * n + z * h
            trend_scr[:, t * C:(t + 1) * C] = jnp.maximum(h, 0.0)   # fused ReLU -> scratch slab

        # ---- temporal-attention seasonal branch: fully batched matmuls + masked softmax ----
        seasonal_cs = seasonal_sb.T                                                     # (B*C, S)
        z1 = jnp.dot(W("w0_bd"), seasonal_cs, preferred_element_type=f32) + W("b0_cs")  # (B*C, S)
        qkv = jnp.dot(z1, W("wqkv_t"), preferred_element_type=f32) + W("bqkv_cs")       # (B*C, 3S)
        q = qkv[:, 0:S]
        k = qkv[:, S:2 * S]
        v = qkv[:, 2 * S:3 * S]
        # block-diagonal mask keeps each batch's (C x C) attention independent
        scores = jnp.dot(q, k.T, preferred_element_type=f32) * inv_sqrt_s + W("mask")   # (B*C, B*C)
        scores = scores - jnp.max(scores, axis=-1, keepdims=True)
        pexp = jnp.exp(scores)
        attn = pexp / jnp.sum(pexp, axis=-1, keepdims=True)        # exact softmax (no approx recip)
        ao = jnp.dot(attn, v, preferred_element_type=f32)                               # (B*C, S)
        o_all = jnp.dot(ao, W("wo_t"), preferred_element_type=f32) + W("bo_cs")         # (B*C, S)
        seasonal_out_sb = o_all.T                                                       # (S, B*C)

        # ---- Model.proj: Linear(2C -> C), concat folded into two block-diag matmuls ----
        out_sb = (jnp.dot(seasonal_out_sb, W("kps"), preferred_element_type=f32)
                  + jnp.dot(trend_scr[...], W("kpt"), preferred_element_type=f32)
                  + W("bp_sb"))                                                         # (S, B*C)

        # ---- un-interleave back to the external (B*S, C) layout (4 block stores) ----
        for b in range(B):
            out_ref[b * S:(b + 1) * S, :] = out_sb[:, b * C:(b + 1) * C].astype(out_ref.dtype)

    # advisory cost estimate (MAC counts of all matmuls, exp/sigmoid/tanh elements, DMA bytes)
    macs = (S * S * (B * C) + S * (B * C) * (B * C3) + B * S * C * C3
            + (B * C) * (B * C) * S + (B * C) * S * (3 * S) + (B * C) * S * (B * C)
            + (B * C) * (B * C) * S + (B * C) * S * S + 2 * S * (B * C) * (B * C))
    cost = pl.CostEstimate(
        flops=int(2 * macs),
        transcendentals=int(B * 3 * S * C + (B * C) * (B * C)),
        bytes_accessed=int(4 * (2 * B * S * C + slab.size)),
    )

    out_flat = pl.pallas_call(
        kernel,
        out_shape=jax.ShapeDtypeStruct((B * S, C), x.dtype),
        in_specs=[pl.BlockSpec(memory_space=pltpu.MemorySpace.VMEM),
                  pl.BlockSpec(memory_space=pltpu.MemorySpace.VMEM)],
        out_specs=pl.BlockSpec(memory_space=pltpu.MemorySpace.VMEM),
        scratch_shapes=[pltpu.VMEM((S, B * C), jnp.float32)],   # GRU output slab
        cost_estimate=cost,
    )(x.reshape(B * S, C), slab)
    return out_flat.reshape(B, S, C)


# ---------------------------------------------------------------------------
# Pure-JAX reference (same semantics, no Pallas) for a sanity check.
# ---------------------------------------------------------------------------
def reference_forward(x, p, avg_mat):
    Bx, Sx, Cx = x.shape
    mm = jnp.einsum('ts,bsc->btc', avg_mat, x)
    seasonal, trend = x - mm, mm

    # GRU: recurrence over dim 0 (batch_first=False quirk)
    w_ih, w_hh, b_ih, b_hh = p["w_ih"], p["w_hh"], p["b_ih"], p["b_hh"]
    h = jnp.broadcast_to(p["h0"][0, 0], (Sx, Cx))
    outs = []
    for t in range(Bx):
        gi = trend[t] @ w_ih.T + b_ih
        gh = h @ w_hh.T + b_hh
        r = jax.nn.sigmoid(gi[:, 0:Cx] + gh[:, 0:Cx])
        z = jax.nn.sigmoid(gi[:, Cx:2 * Cx] + gh[:, Cx:2 * Cx])
        n = jnp.tanh(gi[:, 2 * Cx:] + r * gh[:, 2 * Cx:])
        h = (1.0 - z) * n + z * h
        outs.append(h)
    trend_out = jax.nn.relu(jnp.stack(outs, axis=0))

    # TemporalAttn
    y = seasonal @ p["w0"].T + p["b0"]
    z2 = jnp.transpose(y, (0, 2, 1))                      # (B, C, S)
    ipw, ipb = p["in_proj_w"], p["in_proj_b"]
    q = z2 @ ipw[0:Sx].T + ipb[0:Sx]
    k = z2 @ ipw[Sx:2 * Sx].T + ipb[Sx:2 * Sx]
    v = z2 @ ipw[2 * Sx:].T + ipb[2 * Sx:]
    scores = jnp.einsum('bcs,bds->bcd', q, k) / jnp.sqrt(jnp.float32(Sx))
    attn = jax.nn.softmax(scores, axis=-1)
    ao = jnp.einsum('bcd,bds->bcs', attn, v)
    o = ao @ p["out_proj_w"].T + p["out_proj_b"]
    seasonal_out = jnp.transpose(o, (0, 2, 1))

    temp = jnp.concatenate([seasonal_out, trend_out], axis=2)
    return temp @ p["wp"].T + p["bp"]


if __name__ == "__main__":
    key = jax.random.PRNGKey(0)
    kx, kp = jax.random.split(key)
    x = jax.random.normal(kx, (B, S, C), jnp.float32)
    params = init_params(kp, S, C)

    A = build_avg_matrix(S, KS)
    slab, offsets = pack_weight_slab(params, A)

    out = model_forward(x, slab, offsets)
    out = jax.block_until_ready(out)

    assert out.shape == (B, S, C)
    ref = reference_forward(x, params, jnp.asarray(A))
    np.testing.assert_allclose(np.asarray(out), np.asarray(ref), rtol=2e-2, atol=2e-3)
    print("KERNEL_OK")
</pallas_src>

<mosaic_0001>
module attributes {stable_mosaic.version = 11 : i64} {
  func.func @kernel(%arg0: memref<64x8xf32, #tpu.memory_space<vmem>>, %arg1: memref<376x128xf32, #tpu.memory_space<vmem>>, %arg2: memref<64x8xf32, #tpu.memory_space<vmem>>, %arg3: memref<16x32xf32, #tpu.memory_space<vmem>>) attributes {dimension_semantics = [], scalar_prefetch = 0 : i64, scratch_operands = 1 : i64, tpu.core_type = #tpu.core_type<tc>} {
    %c0 = arith.constant 0 : index
    %c0_0 = arith.constant 0 : index
    %0 = vector.load %arg0[%c0, %c0_0] : memref<64x8xf32, #tpu.memory_space<vmem>>, vector<16x8xf32>
    %c16 = arith.constant 16 : index
    %c0_1 = arith.constant 0 : index
    %1 = vector.load %arg0[%c16, %c0_1] : memref<64x8xf32, #tpu.memory_space<vmem>>, vector<16x8xf32>
    %c32 = arith.constant 32 : index
    %c0_2 = arith.constant 0 : index
    %2 = vector.load %arg0[%c32, %c0_2] : memref<64x8xf32, #tpu.memory_space<vmem>>, vector<16x8xf32>
    %c48 = arith.constant 48 : index
    %c0_3 = arith.constant 0 : index
    %3 = vector.load %arg0[%c48, %c0_3] : memref<64x8xf32, #tpu.memory_space<vmem>>, vector<16x8xf32>
    %4 = tpu.concatenate %0, %1, %2, %3 in 1 : vector<16x8xf32>, vector<16x8xf32>, vector<16x8xf32>, vector<16x8xf32> -> vector<16x32xf32>
    %c0_4 = arith.constant 0 : index
    %c0_5 = arith.constant 0 : index
    %5 = vector.load %arg1[%c0_4, %c0_5] : memref<376x128xf32, #tpu.memory_space<vmem>>, vector<16x16xf32>
    %cst = arith.constant dense<0.000000e+00> : vector<16x32xf32>
    %6 = tpu.matmul %5, %4, %cst {dimension_numbers = #tpu.dot_dimension_numbers<[1], [0], [0], [1], [0, 0, 1, 1], [], []>} : vector<16x16xf32>, vector<16x32xf32>, vector<16x32xf32> -> vector<16x32xf32>
    %7 = arith.subf %4, %6 : vector<16x32xf32>
    %c16_6 = arith.constant 16 : index
    %c0_7 = arith.constant 0 : index
    %8 = vector.load %arg1[%c16_6, %c0_7] : memref<376x128xf32, #tpu.memory_space<vmem>>, vector<32x96xf32>
    %cst_8 = arith.constant dense<0.000000e+00> : vector<16x96xf32>
    %9 = tpu.matmul %6, %8, %cst_8 {dimension_numbers = #tpu.dot_dimension_numbers<[1], [0], [0], [1], [0, 0, 1, 1], [], []>} : vector<16x32xf32>, vector<32x96xf32>, vector<16x96xf32> -> vector<16x96xf32>
    %c48_9 = arith.constant 48 : index
    %c0_10 = arith.constant 0 : index
    %10 = vector.load %arg1[%c48_9, %c0_10] : memref<376x128xf32, #tpu.memory_space<vmem>>, vector<16x96xf32>
    %11 = arith.addf %9, %10 : vector<16x96xf32>
    %c64 = arith.constant 64 : index
    %c0_11 = arith.constant 0 : index
    %12 = vector.load %arg1[%c64, %c0_11] : memref<376x128xf32, #tpu.memory_space<vmem>>, vector<8x24xf32>
    %c72 = arith.constant 72 : index
    %c0_12 = arith.constant 0 : index
    %13 = vector.load %arg1[%c72, %c0_12] : memref<376x128xf32, #tpu.memory_space<vmem>>, vector<16x24xf32>
    %c88 = arith.constant 88 : index
    %c0_13 = arith.constant 0 : index
    %14 = vector.load %arg1[%c88, %c0_13] : memref<376x128xf32, #tpu.memory_space<vmem>>, vector<16x8xf32>
    %15 = vector.extract_strided_slice %11 {offsets = [0, 0], sizes = [16, 24], strides = [1, 1]} : vector<16x96xf32> to vector<16x24xf32>
    %cst_14 = arith.constant dense<0.000000e+00> : vector<16x24xf32>
    %16 = tpu.matmul %14, %12, %cst_14 {dimension_numbers = #tpu.dot_dimension_numbers<[1], [0], [0], [1], [0, 0, 1, 1], [], []>} : vector<16x8xf32>, vector<8x24xf32>, vector<16x24xf32> -> vector<16x24xf32>
    %17 = arith.addf %16, %13 : vector<16x24xf32>
    %18 = vector.extract_strided_slice %15 {offsets = [0, 0], sizes = [16, 8], strides = [1, 1]} : vector<16x24xf32> to vector<16x8xf32>
    %19 = vector.extract_strided_slice %17 {offsets = [0, 0], sizes = [16, 8], strides = [1, 1]} : vector<16x24xf32> to vector<16x8xf32>
    %20 = arith.addf %18, %19 : vector<16x8xf32>
    %21 = arith.negf %20 : vector<16x8xf32>
    %22 = math.exp %21 : vector<16x8xf32>
    %cst_15 = arith.constant 1.000000e+00 : f32
    %23 = vector.broadcast %cst_15 : f32 to vector<16x8xf32>
    %24 = arith.addf %23, %22 : vector<16x8xf32>
    %25 = arith.divf %23, %24 : vector<16x8xf32>
    %26 = vector.extract_strided_slice %15 {offsets = [0, 8], sizes = [16, 8], strides = [1, 1]} : vector<16x24xf32> to vector<16x8xf32>
    %27 = vector.extract_strided_slice %17 {offsets = [0, 8], sizes = [16, 8], strides = [1, 1]} : vector<16x24xf32> to vector<16x8xf32>
    %28 = arith.addf %26, %27 : vector<16x8xf32>
    %29 = arith.negf %28 : vector<16x8xf32>
    %30 = math.exp %29 : vector<16x8xf32>
    %cst_16 = arith.constant 1.000000e+00 : f32
    %31 = vector.broadcast %cst_16 : f32 to vector<16x8xf32>
    %32 = arith.addf %31, %30 : vector<16x8xf32>
    %33 = arith.divf %31, %32 : vector<16x8xf32>
    %34 = vector.extract_strided_slice %15 {offsets = [0, 16], sizes = [16, 8], strides = [1, 1]} : vector<16x24xf32> to vector<16x8xf32>
    %35 = vector.extract_strided_slice %17 {offsets = [0, 16], sizes = [16, 8], strides = [1, 1]} : vector<16x24xf32> to vector<16x8xf32>
    %36 = arith.mulf %25, %35 : vector<16x8xf32>
    %37 = arith.addf %34, %36 : vector<16x8xf32>
    %38 = math.tanh %37 : vector<16x8xf32>
    %cst_17 = arith.constant 1.000000e+00 : f32
    %39 = vector.broadcast %cst_17 : f32 to vector<16x8xf32>
    %40 = arith.subf %39, %33 : vector<16x8xf32>
    %41 = arith.mulf %40, %38 : vector<16x8xf32>
    %42 = arith.mulf %33, %14 : vector<16x8xf32>
    %43 = arith.addf %41, %42 : vector<16x8xf32>
    %cst_18 = arith.constant 0.000000e+00 : f32
    %44 = vector.broadcast %cst_18 : f32 to vector<16x8xf32>
    %45 = arith.maximumf %43, %44 : vector<16x8xf32>
    %c0_19 = arith.constant 0 : index
    %c0_20 = arith.constant 0 : index
    %46 = vector.load %arg3[%c0_19, %c0_20] : memref<16x32xf32, #tpu.memory_space<vmem>>, vector<16x8xf32>
    tpu.vector_store %arg3[%c0_19, %c0_20], %45 {strides = array<i32>} : memref<16x32xf32, #tpu.memory_space<vmem>>, vector<16x8xf32>,
    %47 = vector.extract_strided_slice %11 {offsets = [0, 24], sizes = [16, 24], strides = [1, 1]} : vector<16x96xf32> to vector<16x24xf32>
    %cst_21 = arith.constant dense<0.000000e+00> : vector<16x24xf32>
    %48 = tpu.matmul %43, %12, %cst_21 {dimension_numbers = #tpu.dot_dimension_numbers<[1], [0], [0], [1], [0, 0, 1, 1], [], []>} : vector<16x8xf32>, vector<8x24xf32>, vector<16x24xf32> -> vector<16x24xf32>
    %49 = arith.addf %48, %13 : vector<16x24xf32>
    %50 = vector.extract_strided_slice %47 {offsets = [0, 0], sizes = [16, 8], strides = [1, 1]} : vector<16x24xf32> to vector<16x8xf32>
    %51 = vector.extract_strided_slice %49 {offsets = [0, 0], sizes = [16, 8], strides = [1, 1]} : vector<16x24xf32> to vector<16x8xf32>
    %52 = arith.addf %50, %51 : vector<16x8xf32>
    %53 = arith.negf %52 : vector<16x8xf32>
    %54 = math.exp %53 : vector<16x8xf32>
    %cst_22 = arith.constant 1.000000e+00 : f32
    %55 = vector.broadcast %cst_22 : f32 to vector<16x8xf32>
    %56 = arith.addf %55, %54 : vector<16x8xf32>
    %57 = arith.divf %55, %56 : vector<16x8xf32>
    %58 = vector.extract_strided_slice %47 {offsets = [0, 8], sizes = [16, 8], strides = [1, 1]} : vector<16x24xf32> to vector<16x8xf32>
    %59 = vector.extract_strided_slice %49 {offsets = [0, 8], sizes = [16, 8], strides = [1, 1]} : vector<16x24xf32> to vector<16x8xf32>
    %60 = arith.addf %58, %59 : vector<16x8xf32>
    %61 = arith.negf %60 : vector<16x8xf32>
    %62 = math.exp %61 : vector<16x8xf32>
    %cst_23 = arith.constant 1.000000e+00 : f32
    %63 = vector.broadcast %cst_23 : f32 to vector<16x8xf32>
    %64 = arith.addf %63, %62 : vector<16x8xf32>
    %65 = arith.divf %63, %64 : vector<16x8xf32>
    %66 = vector.extract_strided_slice %47 {offsets = [0, 16], sizes = [16, 8], strides = [1, 1]} : vector<16x24xf32> to vector<16x8xf32>
    %67 = vector.extract_strided_slice %49 {offsets = [0, 16], sizes = [16, 8], strides = [1, 1]} : vector<16x24xf32> to vector<16x8xf32>
    %68 = arith.mulf %57, %67 : vector<16x8xf32>
    %69 = arith.addf %66, %68 : vector<16x8xf32>
    %70 = math.tanh %69 : vector<16x8xf32>
    %cst_24 = arith.constant 1.000000e+00 : f32
    %71 = vector.broadcast %cst_24 : f32 to vector<16x8xf32>
    %72 = arith.subf %71, %65 : vector<16x8xf32>
    %73 = arith.mulf %72, %70 : vector<16x8xf32>
    %74 = arith.mulf %65, %43 : vector<16x8xf32>
    %75 = arith.addf %73, %74 : vector<16x8xf32>
    %cst_25 = arith.constant 0.000000e+00 : f32
    %76 = vector.broadcast %cst_25 : f32 to vector<16x8xf32>
    %77 = arith.maximumf %75, %76 : vector<16x8xf32>
    %c0_26 = arith.constant 0 : index
    %c8 = arith.constant 8 : index
    %78 = vector.load %arg3[%c0_26, %c8] : memref<16x32xf32, #tpu.memory_space<vmem>>, vector<16x8xf32>
    tpu.vector_store %arg3[%c0_26, %c8], %77 {strides = array<i32>} : memref<16x32xf32, #tpu.memory_space<vmem>>, vector<16x8xf32>,
    %79 = vector.extract_strided_slice %11 {offsets = [0, 48], sizes = [16, 24], strides = [1, 1]} : vector<16x96xf32> to vector<16x24xf32>
    %cst_27 = arith.constant dense<0.000000e+00> : vector<16x24xf32>
    %80 = tpu.matmul %75, %12, %cst_27 {dimension_numbers = #tpu.dot_dimension_numbers<[1], [0], [0], [1], [0, 0, 1, 1], [], []>} : vector<16x8xf32>, vector<8x24xf32>, vector<16x24xf32> -> vector<16x24xf32>
    %81 = arith.addf %80, %13 : vector<16x24xf32>
    %82 = vector.extract_strided_slice %79 {offsets = [0, 0], sizes = [16, 8], strides = [1, 1]} : vector<16x24xf32> to vector<16x8xf32>
    %83 = vector.extract_strided_slice %81 {offsets = [0, 0], sizes = [16, 8], strides = [1, 1]} : vector<16x24xf32> to vector<16x8xf32>
    %84 = arith.addf %82, %83 : vector<16x8xf32>
    %85 = arith.negf %84 : vector<16x8xf32>
    %86 = math.exp %85 : vector<16x8xf32>
    %cst_28 = arith.constant 1.000000e+00 : f32
    %87 = vector.broadcast %cst_28 : f32 to vector<16x8xf32>
    %88 = arith.addf %87, %86 : vector<16x8xf32>
    %89 = arith.divf %87, %88 : vector<16x8xf32>
    %90 = vector.extract_strided_slice %79 {offsets = [0, 8], sizes = [16, 8], strides = [1, 1]} : vector<16x24xf32> to vector<16x8xf32>
    %91 = vector.extract_strided_slice %81 {offsets = [0, 8], sizes = [16, 8], strides = [1, 1]} : vector<16x24xf32> to vector<16x8xf32>
    %92 = arith.addf %90, %91 : vector<16x8xf32>
    %93 = arith.negf %92 : vector<16x8xf32>
    %94 = math.exp %93 : vector<16x8xf32>
    %cst_29 = arith.constant 1.000000e+00 : f32
    %95 = vector.broadcast %cst_29 : f32 to vector<16x8xf32>
    %96 = arith.addf %95, %94 : vector<16x8xf32>
    %97 = arith.divf %95, %96 : vector<16x8xf32>
    %98 = vector.extract_strided_slice %79 {offsets = [0, 16], sizes = [16, 8], strides = [1, 1]} : vector<16x24xf32> to vector<16x8xf32>
    %99 = vector.extract_strided_slice %81 {offsets = [0, 16], sizes = [16, 8], strides = [1, 1]} : vector<16x24xf32> to vector<16x8xf32>
    %100 = arith.mulf %89, %99 : vector<16x8xf32>
    %101 = arith.addf %98, %100 : vector<16x8xf32>
    %102 = math.tanh %101 : vector<16x8xf32>
    %cst_30 = arith.constant 1.000000e+00 : f32
    %103 = vector.broadcast %cst_30 : f32 to vector<16x8xf32>
    %104 = arith.subf %103, %97 : vector<16x8xf32>
    %105 = arith.mulf %104, %102 : vector<16x8xf32>
    %106 = arith.mulf %97, %75 : vector<16x8xf32>
    %107 = arith.addf %105, %106 : vector<16x8xf32>
    %cst_31 = arith.constant 0.000000e+00 : f32
    %108 = vector.broadcast %cst_31 : f32 to vector<16x8xf32>
    %109 = arith.maximumf %107, %108 : vector<16x8xf32>
    %c0_32 = arith.constant 0 : index
    %c16_33 = arith.constant 16 : index
    %110 = vector.load %arg3[%c0_32, %c16_33] : memref<16x32xf32, #tpu.memory_space<vmem>>, vector<16x8xf32>
    tpu.vector_store %arg3[%c0_32, %c16_33], %109 {strides = array<i32>} : memref<16x32xf32, #tpu.memory_space<vmem>>, vector<16x8xf32>,
    %111 = vector.extract_strided_slice %11 {offsets = [0, 72], sizes = [16, 24], strides = [1, 1]} : vector<16x96xf32> to vector<16x24xf32>
    %cst_34 = arith.constant dense<0.000000e+00> : vector<16x24xf32>
    %112 = tpu.matmul %107, %12, %cst_34 {dimension_numbers = #tpu.dot_dimension_numbers<[1], [0], [0], [1], [0, 0, 1, 1], [], []>} : vector<16x8xf32>, vector<8x24xf32>, vector<16x24xf32> -> vector<16x24xf32>
    %113 = arith.addf %112, %13 : vector<16x24xf32>
    %114 = vector.extract_strided_slice %111 {offsets = [0, 0], sizes = [16, 8], strides = [1, 1]} : vector<16x24xf32> to vector<16x8xf32>
    %115 = vector.extract_strided_slice %113 {offsets = [0, 0], sizes = [16, 8], strides = [1, 1]} : vector<16x24xf32> to vector<16x8xf32>
    %116 = arith.addf %114, %115 : vector<16x8xf32>
    %117 = arith.negf %116 : vector<16x8xf32>
    %118 = math.exp %117 : vector<16x8xf32>
    %cst_35 = arith.constant 1.000000e+00 : f32
    %119 = vector.broadcast %cst_35 : f32 to vector<16x8xf32>
    %120 = arith.addf %119, %118 : vector<16x8xf32>
    %121 = arith.divf %119, %120 : vector<16x8xf32>
    %122 = vector.extract_strided_slice %111 {offsets = [0, 8], sizes = [16, 8], strides = [1, 1]} : vector<16x24xf32> to vector<16x8xf32>
    %123 = vector.extract_strided_slice %113 {offsets = [0, 8], sizes = [16, 8], strides = [1, 1]} : vector<16x24xf32> to vector<16x8xf32>
    %124 = arith.addf %122, %123 : vector<16x8xf32>
    %125 = arith.negf %124 : vector<16x8xf32>
    %126 = math.exp %125 : vector<16x8xf32>
    %cst_36 = arith.constant 1.000000e+00 : f32
    %127 = vector.broadcast %cst_36 : f32 to vector<16x8xf32>
    %128 = arith.addf %127, %126 : vector<16x8xf32>
    %129 = arith.divf %127, %128 : vector<16x8xf32>
    %130 = vector.extract_strided_slice %111 {offsets = [0, 16], sizes = [16, 8], strides = [1, 1]} : vector<16x24xf32> to vector<16x8xf32>
    %131 = vector.extract_strided_slice %113 {offsets = [0, 16], sizes = [16, 8], strides = [1, 1]} : vector<16x24xf32> to vector<16x8xf32>
    %132 = arith.mulf %121, %131 : vector<16x8xf32>
    %133 = arith.addf %130, %132 : vector<16x8xf32>
    %134 = math.tanh %133 : vector<16x8xf32>
    %cst_37 = arith.constant 1.000000e+00 : f32
    %135 = vector.broadcast %cst_37 : f32 to vector<16x8xf32>
    %136 = arith.subf %135, %129 : vector<16x8xf32>
    %137 = arith.mulf %136, %134 : vector<16x8xf32>
    %138 = arith.mulf %129, %107 : vector<16x8xf32>
    %139 = arith.addf %137, %138 : vector<16x8xf32>
    %cst_38 = arith.constant 0.000000e+00 : f32
    %140 = vector.broadcast %cst_38 : f32 to vector<16x8xf32>
    %141 = arith.maximumf %139, %140 : vector<16x8xf32>
    %c0_39 = arith.constant 0 : index
    %c24 = arith.constant 24 : index
    %142 = vector.load %arg3[%c0_39, %c24] : memref<16x32xf32, #tpu.memory_space<vmem>>, vector<16x8xf32>
    tpu.vector_store %arg3[%c0_39, %c24], %141 {strides = array<i32>} : memref<16x32xf32, #tpu.memory_space<vmem>>, vector<16x8xf32>,
    %143 = tpu.transpose %7, [1, 0] : vector<16x32xf32> -> vector<32x16xf32>
    %c104 = arith.constant 104 : index
    %c0_40 = arith.constant 0 : index
    %144 = vector.load %arg1[%c104, %c0_40] : memref<376x128xf32, #tpu.memory_space<vmem>>, vector<32x32xf32>
    %cst_41 = arith.constant dense<0.000000e+00> : vector<32x16xf32>
    %145 = tpu.matmul %144, %143, %cst_41 {dimension_numbers = #tpu.dot_dimension_numbers<[1], [0], [0], [1], [0, 0, 1, 1], [], []>} : vector<32x32xf32>, vector<32x16xf32>, vector<32x16xf32> -> vector<32x16xf32>
    %c136 = arith.constant 136 : index
    %c0_42 = arith.constant 0 : index
    %146 = vector.load %arg1[%c136, %c0_42] : memref<376x128xf32, #tpu.memory_space<vmem>>, vector<32x16xf32>
    %147 = arith.addf %145, %146 : vector<32x16xf32>
    %c168 = arith.constant 168 : index
    %c0_43 = arith.constant 0 : index
    %148 = vector.load %arg1[%c168, %c0_43] : memref<376x128xf32, #tpu.memory_space<vmem>>, vector<16x48xf32>
    %cst_44 = arith.constant dense<0.000000e+00> : vector<32x48xf32>
    %149 = tpu.matmul %147, %148, %cst_44 {dimension_numbers = #tpu.dot_dimension_numbers<[1], [0], [0], [1], [0, 0, 1, 1], [], []>} : vector<32x16xf32>, vector<16x48xf32>, vector<32x48xf32> -> vector<32x48xf32>
    %c184 = arith.constant 184 : index
    %c0_45 = arith.constant 0 : index
    %150 = vector.load %arg1[%c184, %c0_45] : memref<376x128xf32, #tpu.memory_space<vmem>>, vector<32x48xf32>
    %151 = arith.addf %149, %150 : vector<32x48xf32>
    %152 = vector.extract_strided_slice %151 {offsets = [0, 0], sizes = [32, 16], strides = [1, 1]} : vector<32x48xf32> to vector<32x16xf32>
    %153 = vector.extract_strided_slice %151 {offsets = [0, 16], sizes = [32, 16], strides = [1, 1]} : vector<32x48xf32> to vector<32x16xf32>
    %154 = vector.extract_strided_slice %151 {offsets = [0, 32], sizes = [32, 16], strides = [1, 1]} : vector<32x48xf32> to vector<32x16xf32>
    %155 = tpu.transpose %153, [1, 0] : vector<32x16xf32> -> vector<16x32xf32>
    %cst_46 = arith.constant dense<0.000000e+00> : vector<32x32xf32>
    %156 = tpu.matmul %152, %155, %cst_46 {dimension_numbers = #tpu.dot_dimension_numbers<[1], [0], [0], [1], [0, 0, 1, 1], [], []>} : vector<32x16xf32>, vector<16x32xf32>, vector<32x32xf32> -> vector<32x32xf32>
    %cst_47 = arith.constant 2.500000e-01 : f32
    %157 = vector.broadcast %cst_47 : f32 to vector<32x32xf32>
    %158 = arith.mulf %156, %157 : vector<32x32xf32>
    %c264 = arith.constant 264 : index
    %c0_48 = arith.constant 0 : index
    %159 = vector.load %arg1[%c264, %c0_48] : memref<376x128xf32, #tpu.memory_space<vmem>>, vector<32x32xf32>
    %160 = arith.addf %158, %159 : vector<32x32xf32>
    %cst_49 = arith.constant dense<0xFF800000> : vector<32xf32>
    %161 = vector.multi_reduction <maximumf>, %160, %cst_49 [1] : vector<32x32xf32> to vector<32xf32>
    %162 = vector.shape_cast %161 : vector<32xf32> to vector<32x1xf32>
    %163 = vector.broadcast %162 : vector<32x1xf32> to vector<32x32xf32>
    %164 = arith.subf %160, %163 : vector<32x32xf32>
    %165 = math.exp %164 : vector<32x32xf32>
    %cst_50 = arith.constant dense<0.000000e+00> : vector<32xf32>
    %166 = vector.multi_reduction <add>, %165, %cst_50 [1] : vector<32x32xf32> to vector<32xf32>
    %167 = vector.shape_cast %166 : vector<32xf32> to vector<32x1xf32>
    %168 = vector.broadcast %167 : vector<32x1xf32> to vector<32x32xf32>
    %169 = arith.divf %165, %168 : vector<32x32xf32>
    %cst_51 = arith.constant dense<0.000000e+00> : vector<32x16xf32>
    %170 = tpu.matmul %169, %154, %cst_51 {dimension_numbers = #tpu.dot_dimension_numbers<[1], [0], [0], [1], [0, 0, 1, 1], [], []>} : vector<32x32xf32>, vector<32x16xf32>, vector<32x16xf32> -> vector<32x16xf32>
    %c216 = arith.constant 216 : index
    %c0_52 = arith.constant 0 : index
    %171 = vector.load %arg1[%c216, %c0_52] : memref<376x128xf32, #tpu.memory_space<vmem>>, vector<16x16xf32>
    %cst_53 = arith.constant dense<0.000000e+00> : vector<32x16xf32>
    %172 = tpu.matmul %170, %171, %cst_53 {dimension_numbers = #tpu.dot_dimension_numbers<[1], [0], [0], [1], [0, 0, 1, 1], [], []>} : vector<32x16xf32>, vector<16x16xf32>, vector<32x16xf32> -> vector<32x16xf32>
    %c232 = arith.constant 232 : index
    %c0_54 = arith.constant 0 : index
    %173 = vector.load %arg1[%c232, %c0_54] : memref<376x128xf32, #tpu.memory_space<vmem>>, vector<32x16xf32>
    %174 = arith.addf %172, %173 : vector<32x16xf32>
    %175 = tpu.transpose %174, [1, 0] : vector<32x16xf32> -> vector<16x32xf32>
    %c296 = arith.constant 296 : index
    %c0_55 = arith.constant 0 : index
    %176 = vector.load %arg1[%c296, %c0_55] : memref<376x128xf32, #tpu.memory_space<vmem>>, vector<32x32xf32>
    %cst_56 = arith.constant dense<0.000000e+00> : vector<16x32xf32>
    %177 = tpu.matmul %175, %176, %cst_56 {dimension_numbers = #tpu.dot_dimension_numbers<[1], [0], [0], [1], [0, 0, 1, 1], [], []>} : vector<16x32xf32>, vector<32x32xf32>, vector<16x32xf32> -> vector<16x32xf32>
    %c0_57 = arith.constant 0 : index
    %c0_58 = arith.constant 0 : index
    %178 = vector.load %arg3[%c0_57, %c0_58] : memref<16x32xf32, #tpu.memory_space<vmem>>, vector<16x32xf32>
    %c328 = arith.constant 328 : index
    %c0_59 = arith.constant 0 : index
    %179 = vector.load %arg1[%c328, %c0_59] : memref<376x128xf32, #tpu.memory_space<vmem>>, vector<32x32xf32>
    %cst_60 = arith.constant dense<0.000000e+00> : vector<16x32xf32>
    %180 = tpu.matmul %178, %179, %cst_60 {dimension_numbers = #tpu.dot_dimension_numbers<[1], [0], [0], [1], [0, 0, 1, 1], [], []>} : vector<16x32xf32>, vector<32x32xf32>, vector<16x32xf32> -> vector<16x32xf32>
    %181 = arith.addf %177, %180 : vector<16x32xf32>
    %c360 = arith.constant 360 : index
    %c0_61 = arith.constant 0 : index
    %182 = vector.load %arg1[%c360, %c0_61] : memref<376x128xf32, #tpu.memory_space<vmem>>, vector<16x32xf32>
    %183 = arith.addf %181, %182 : vector<16x32xf32>
    %184 = vector.extract_strided_slice %183 {offsets = [0, 0], sizes = [16, 8], strides = [1, 1]} : vector<16x32xf32> to vector<16x8xf32>
    %c0_62 = arith.constant 0 : index
    %c0_63 = arith.constant 0 : index
    %185 = vector.load %arg2[%c0_62, %c0_63] : memref<64x8xf32, #tpu.memory_space<vmem>>, vector<16x8xf32>
    tpu.vector_store %arg2[%c0_62, %c0_63], %184 {strides = array<i32>} : memref<64x8xf32, #tpu.memory_space<vmem>>, vector<16x8xf32>,
    %186 = vector.extract_strided_slice %183 {offsets = [0, 8], sizes = [16, 8], strides = [1, 1]} : vector<16x32xf32> to vector<16x8xf32>
    %c16_64 = arith.constant 16 : index
    %c0_65 = arith.constant 0 : index
    %187 = vector.load %arg2[%c16_64, %c0_65] : memref<64x8xf32, #tpu.memory_space<vmem>>, vector<16x8xf32>
    tpu.vector_store %arg2[%c16_64, %c0_65], %186 {strides = array<i32>} : memref<64x8xf32, #tpu.memory_space<vmem>>, vector<16x8xf32>,
    %188 = vector.extract_strided_slice %183 {offsets = [0, 16], sizes = [16, 8], strides = [1, 1]} : vector<16x32xf32> to vector<16x8xf32>
    %c32_66 = arith.constant 32 : index
    %c0_67 = arith.constant 0 : index
    %189 = vector.load %arg2[%c32_66, %c0_67] : memref<64x8xf32, #tpu.memory_space<vmem>>, vector<16x8xf32>
    tpu.vector_store %arg2[%c32_66, %c0_67], %188 {strides = array<i32>} : memref<64x8xf32, #tpu.memory_space<vmem>>, vector<16x8xf32>,
    %190 = vector.extract_strided_slice %183 {offsets = [0, 24], sizes = [16, 8], strides = [1, 1]} : vector<16x32xf32> to vector<16x8xf32>
    %c48_68 = arith.constant 48 : index
    %c0_69 = arith.constant 0 : index
    %191 = vector.load %arg2[%c48_68, %c0_69] : memref<64x8xf32, #tpu.memory_space<vmem>>, vector<16x8xf32>
    tpu.vector_store %arg2[%c48_68, %c0_69], %190 {strides = array<i32>} : memref<64x8xf32, #tpu.memory_space<vmem>>, vector<16x8xf32>,
    return
  }
}

</mosaic_0001>

<bundles_post_ra>
// kernel: tpu_custom_call.1
= control target key start
LH: loop header
LB: loop body
LE: loop exit
PB: predicated region body
PF: predicated region fallthrough
CT: control target
= control target key end

     0   :  { %7 = vsyncpa [#allocation4], 0  ;;  %s1347_s12 = smov [#allocation3]   ;;  %s1348_s14 = smov 128   ;;  %s1681_s0 = inlined_call_operand.vmem [shape: f32[64,8], index: 0, kind: input, shape index: {}]   ;;  %s1682_s1 = inlined_call_operand.hbm [shape: f32[376,128], index: 1, kind: input, shape index: {}]   ;;  %s1683_s2 = inlined_call_operand.vmem [shape: f32[64,8], index: 2, kind: output, shape index: {}]  }
   0x1   :  { %s14_s11 = sshll.u32 %s1682_s1, 4  ;;  %s16_s13 = sshll.u32 %s1347_s12, 4  ;;  %s15_s11 = int_to_ptr.hbm [resolvable:$true] %s14_s11  ;;  %s17_s13 = int_to_ptr.vmem [resolvable:$true] %s16_s13 }
   0x2   :  { %s1349_s15 = smov 8  }
   0x3   :  { %22 = dma.hbm_to_vmem [thread:$0]  %s15_s11, 6016, %s17_s13, [#allocation4], %s1348_s14, %s1348_s14, %s1349_s15  }
   0x4   :  { %1345 = dma.done.wait [#allocation4], 6016  }
   0x5   :  { %1346 = vsyncadd [#allocation4], 4294961280  ;;  %v30_v0 = vld [vmem:[%s1681_s0 + $0x18] sm:$0xff]  ;;  %v29_v1 = vld [vmem:[%s1681_s0 + $0x10] sm:$0xff]  ;;  %s1350_s21 = smov 16   ;;  %s1351_s28 = smov 24  }
   0x6   :  { %39 = vrot.lane.b32.xlu0 %v30_v0, %s1349_s15  ;;  %37 = vrot.lane.b32.xlu1 %v29_v1, %s1349_s15  ;;  %v31_v2 = vld [vmem:[%s1681_s0 + $0x20] sm:$0xff]  ;;  %v32_v3 = vld [vmem:[%s1681_s0 + $0x28] sm:$0xff]  ;;  %v137_v6 = vld [vmem:[#allocation3 + $0x40] sm:$0xff]  ;;  %vm59_vm0 = vcmask 64512   ;;  %vm62_vm1 = vcmask 130048   ;;  %vm65_vm2 = vcmask 195584  }
   0x7   :  { %45 = vrot.lane.b32.xlu2 %v31_v2, %s1350_s21  ;;  %v34_v4 = vld [vmem:[%s1681_s0 + $0x38] sm:$0xff]  ;;  %v33_v5 = vld [vmem:[%s1681_s0 + $0x30] sm:$0xff]  ;;  %1231 = vmatpush.msra.mxu2 %v137_v6  ;;  %v102_v10 = vld [vmem:[#allocation3 + $0x18] sm:$0xff]  ;;  %vm107_vm3 = vcmask 261120   ;;  %s1353_s5 = smov 120   ;;  %s1354_s6 = smov 96  }
   0x8   :  { %v1404_v7 = vld [vmem:[#allocation3 + $0x60] sm:$0xff]  ;;  %v104_v8 = vld [vmem:[#allocation3 + $0x28] sm:$0xff]  ;;  %v27_v14 = vld [vmem:[%s1681_s0] sm:$0xff]  ;;  %s1355_s7 = smov 48   ;;  %s1356_s8 = smov 32  }
   0x9   :  { %126 = vmatpush.msra.mxu1 %v104_v8  ;;  %v103_v9 = vld [vmem:[#allocation3 + $0x20] sm:$0xff]  ;;  %1184 = vmatmul.msk.f32.vlgmr.msra.gmra.mxu2 %vm59_vm0, %v1404_v7  ;;  %v28_v15 = vld [vmem:[%s1681_s0 + $0x8] sm:$0xff]  ;;  %v69_v25 = vld [vmem:[#allocation3 + $0x8] sm:$0xff]  ;;  %s1352_s0 = smov 112   ;;  %s1357_s9 = smov 72  }
   0xa   :  { %428 = vmatpush.msrb.mxu2 %v137_v6  ;;  %v68_v24 = vld [vmem:[#allocation3] sm:$0xff]  ;;  %v101_v27 = vld [vmem:[#allocation3 + $0x10] sm:$0xff]  ;;  %v140_v35 = vld [vmem:[#allocation3 + $0x58] sm:$0xff]  ;;  %s1358_s10 = smov 56   ;;  %s1359_s11 = smov 88  }
   0xb   :  { %127 = vmatpush.msra.mxu1 %v103_v9  ;;  %v1420_v28 = vld [vmem:[#allocation3 + $0x50] sm:$0xff]  ;;  %v106_v37 = vld [vmem:[#allocation3 + $0x38] sm:$0xff]  ;;  %v1432_v42 = vld [vmem:[#allocation3 + $0x48] sm:$0xff]  ;;  %s1360_s12 = smov 104  }
   0xc   :  { %v105_v59 = vld [vmem:[#allocation3 + $0x30] sm:$0xff] }
   0xd   :  { %128 = vmatpush.msra.mxu1 %v102_v10 }
   0xe   :  { %47 = vrot.lane.b32.xlu0 %v32_v3, %s1350_s21  ;;  %55 = vrot.lane.b32.xlu1 %v34_v4, %s1351_s28 }
   0xf   :  { %53 = vrot.lane.b32.xlu2 %v33_v5, %s1351_s28  ;;  %129 = vmatpush.msra.mxu1 %v101_v27 }
  0x11   :  { %163 = vmatpush.msrb.mxu1 %v137_v6 }
  0x61   :  { %v46_v11 = vpop.permute.xlu2 %45 }
  0x69   :  { %v54_v20 = vpop.permute.xlu2 %53 }
  0x78   :  { %v40_v12 = vpop.permute.xlu0 %39  ;;  %v38_v13 = vpop.permute.xlu1 %37 }
  0x79   :  { %v60_v16 = vsel %vm59_vm0, %v27_v14, %v38_v13  ;;  %v61_v17 = vsel %vm59_vm0, %v28_v15, %v40_v12 }
  0x7a   :  { %v63_v22 = vsel %vm62_vm1, %v60_v16, %v46_v11 }
  0x7b   :  { %v66_v26 = vsel %vm65_vm2, %v63_v22, %v54_v20 }
  0x80   :  { %v48_v18 = vpop.permute.xlu0 %47  ;;  %v56_v19 = vpop.permute.xlu1 %55 }
  0x81   :  { %v64_v21 = vsel %vm62_vm1, %v61_v17, %v48_v18 }
  0x82   :  { %v67_v23 = vsel %vm65_vm2, %v64_v21, %v56_v19 }
  0x83   :  { %90 = vmatpush.msra.mxu0 %v67_v23  ;;  %1229 = vmatpush.msra.mxu3 %v67_v23 }
  0x85   :  { %91 = vmatpush.msra.mxu0 %v66_v26  ;;  %1230 = vmatpush.msra.mxu3 %v66_v26 }
  0x86   :  { %1179 = vmatmul.msk.f32.vlgmr.msra.gmra.mxu0 %vm62_vm1, %v68_v24  ;;  %1180 = vmatmul.msk.f32.vlgmr.msra.gmra.mxu3 %vm62_vm1, %v69_v25 }
  0x87   :  { %292 = vmatpush.msrb.mxu3 %v137_v6 }
  0x89   :  { %564 = vmatpush.msra.mxu3 %v137_v6 }
  0x8c   :  { %v168_v29 = vpop.f32.mrf.mxu2 }
  0x8d   :  { %v169_v30 = vadd.f32 %v168_v29, %v1420_v28 }
  0x8f   :  { %215 = vrot.lane.b32.xlu1 %v169_v30, %s1352_s0 }
 0x101   :  { %v216_v54 = vpop.permute.xlu1 %215 }
 0x103   :  { %v93_v31 = vpop.f32.mrf.mxu0 }
 0x104   :  { %1181 = vmatmul.msk.f32.vlgmr.msra.gmra.mxu1 %vm107_vm3, %v93_v31  ;;  %v99_v34 = vsub.f32 %v66_v26, %v93_v31 }
 0x109   :  { %v96_v32 = vpop.f32.mrf.mxu3 }
 0x10a   :  { %v100_v33 = vsub.f32 %v67_v23, %v96_v32 }
 0x10c   :  { %1182 = vmatmul.msk.f32.gmra.mxu1 %vm107_vm3, %v96_v32  ;;  %1199 = vmatpush.xpose.msk.msrb.mxu0 %vm107_vm3, %v100_v33 }
 0x110   :  { %1200 = vmatpush.xpose.msk.msrb.mxu0 %vm107_vm3, %v99_v34 }
 0x114   :  { %1183 = vmatmul.msk.f32.vlgmr.msrb.gmra.mxu1 %vm59_vm0, %v140_v35 }
 0x181   :  { %v131_v36 = vpop.f32.mrf.mxu1 }
 0x182   :  { %v1437_v60 = vadd.f32 %v131_v36, %v105_v59 }
 0x189   :  { %v134_v38 = vpop.f32.mrf.mxu1 }
 0x18a   :  { %v1429_v39 = vadd.f32 %v134_v38, %v106_v37 }
 0x18c   :  { %v172_v40 = vadd.f32 %v169_v30, %v1429_v39 }
 0x18e   :  { %v1186_v41 = vmul.f32 -1.442695, %v172_v40 }
 0x190   :  { %1257 = vpow2.f32 %v1186_v41 }
 0x191   :  { %v165_v43 = vpop.f32.mrf.mxu1 }
 0x192   :  { %v166_v44 = vadd.f32 %v165_v43, %v1432_v42 }
 0x194   :  { %213 = vrot.lane.b32.xlu0 %v166_v44, %s1352_s0  ;;  %v171_v61 = vadd.f32 %v166_v44, %v1437_v60 }
 0x196   :  { %v1258_v45 = vpop.eup %1257  ;;  %v1185_v62 = vmul.f32 -1.442695, %v171_v61 }
 0x197   :  { %v180_v46 = vadd.f32 1.0, %v1258_v45  ;;  %v675_v45 = vld [vmem:[#allocation3 + $0x68] sm:$0xff] }
 0x198   :  { %1201 = vmatmul.msk.f32.vlgmr.msrb.gmra.mxu0 %vm107_vm3, %v675_v45 }
 0x199   :  { %1259 = vrcp.f32 %v180_v46  ;;  %v207_v50 = vand.u32 2147483648, %v180_v46  ;;  %v205_v52 = vand.u32 2147483647, %v180_v46  ;;  %vm201_vm5 = vweird.f32 %v180_v46 }
 0x19a   :  { %1261 = vpow2.f32 %v1185_v62 }
 0x19b   :  { %v208_v55 = vor.u32 1.1754944e-38, %v207_v50  ;;  %vm206_vm7 = vcmp.eq.f32.partialorder %v205_v52, 8.507059e+37 }
 0x19f   :  { %v1260_v47 = vpop.eup %1259 }
 0x1a0   :  { %v197_v48 = vmul.f32 %v1260_v47, %v180_v46  ;;  %vm202_vm4 = vweird.f32 %v1260_v47  ;;  %v1262_v63 = vpop.eup %1261 }
 0x1a1   :  { %vm203_vm6 = vmor %vm201_vm5, %vm202_vm4  ;;  %v179_v0 = vadd.f32 1.0, %v1262_v63 }
 0x1a2   :  { %v198_v49 = vsub.f32 1.0, %v197_v48 }
 0x1a3   :  { %1263 = vrcp.f32 %v179_v0  ;;  %v192_v6 = vand.u32 2147483648, %v179_v0  ;;  %vm186_vm9 = vweird.f32 %v179_v0  ;;  %v190_v8 = vand.u32 2147483647, %v179_v0 }
 0x1a4   :  { %v199_v51 = vmul.f32 %v1260_v47, %v198_v49  ;;  %v676_v49 = vld [vmem:[#allocation3 + $0x70] sm:$0xff] }
 0x1a5   :  { %v193_v10 = vor.u32 1.1754944e-38, %v192_v6  ;;  %vm191_vm11 = vcmp.eq.f32.partialorder %v190_v8, 8.507059e+37  ;;  %1202 = vmatmul.msk.f32.gmra.mxu0 %vm107_vm3, %v676_v49 }
 0x1a6   :  { %v200_v53 = vadd.f32 %v1260_v47, %v199_v51 }
 0x1a8   :  { %v204_v56 = vsel %vm203_vm6, %v1260_v47, %v200_v53 }
 0x1a9   :  { %v209_v57 = vsel %vm206_vm7, %v208_v55, %v204_v56  ;;  %v1264_v1 = vpop.eup %1263  ;;  %v677_v55 = vld [vmem:[#allocation3 + $0x78] sm:$0xff] }
 0x1aa   :  { %v220_v58 = vmul.f32 %v216_v54, %v209_v57  ;;  %v182_v2 = vmul.f32 %v1264_v1, %v179_v0  ;;  %vm187_vm8 = vweird.f32 %v1264_v1  ;;  %v234_v27 = vsub.f32 1.0, %v209_v57 }
 0x1ab   :  { %vm188_vm10 = vmor %vm186_vm9, %vm187_vm8 }
 0x1ac   :  { %225 = vrot.lane.b32.xlu0 %v220_v58, %s1350_s21  ;;  %v183_v3 = vsub.f32 1.0, %v182_v2 }
 0x1ad   :  { %1203 = vmatmul.msk.f32.gmra.mxu0 %vm107_vm3, %v677_v55 }
 0x1ae   :  { %v184_v4 = vmul.f32 %v1264_v1, %v183_v3 }
 0x1b0   :  { %v185_v5 = vadd.f32 %v1264_v1, %v184_v4 }
 0x1b2   :  { %v189_v9 = vsel %vm188_vm10, %v1264_v1, %v185_v5 }
 0x1b3   :  { %v194_v12 = vsel %vm191_vm11, %v193_v10, %v189_v9 }
 0x1b4   :  { %v233_v21 = vsub.f32 1.0, %v194_v12 }
 0x206   :  { %v214_v11 = vpop.permute.xlu0 %213 }
 0x207   :  { %v219_v13 = vmul.f32 %v214_v11, %v194_v12 }
 0x209   :  { %223 = vrot.lane.b32.xlu2 %v219_v13, %s1350_s21 }
 0x211   :  { %245 = vrot.lane.b32.xlu2 %v140_v35, %s1349_s15 }
 0x21e   :  { %v226_v14 = vpop.permute.xlu0 %225 }
 0x21f   :  { %v230_v15 = vadd.f32 %v226_v14, %v1429_v39 }
 0x221   :  { %1265 = vtanh.f32 %v230_v15  ;;  %v678_v15 = vld [vmem:[#allocation3 + $0x80] sm:$0xff] }
 0x222   :  { %1204 = vmatmul.msk.f32.gmra.mxu0 %vm107_vm3, %v678_v15 }
 0x227   :  { %v1266_v16 = vpop.eup %1265 }
 0x228   :  { %239 = vrot.lane.b32.xlu0 %v1266_v16, %s1353_s5 }
 0x263   :  { %v224_v17 = vpop.permute.xlu2 %223 }
 0x264   :  { %v229_v18 = vadd.f32 %v224_v17, %v1437_v60 }
 0x266   :  { %1267 = vtanh.f32 %v229_v18 }
 0x26b   :  { %v246_v20 = vpop.permute.xlu2 %245 }
 0x26c   :  { %v1268_v19 = vpop.eup %1267  ;;  %v251_v23 = vmul.f32 %v246_v20, %v194_v12  ;;  %v731_v20 = vld [vmem:[#allocation3 + $0xb0] sm:$0xff] }
 0x26d   :  { %237 = vrot.lane.b32.xlu1 %v1268_v19, %s1353_s5  ;;  %v679_v19 = vld [vmem:[#allocation3 + $0x88] sm:$0xff]  ;;  %762 = vmatpush.msra.mxu1 %v731_v20 }
 0x275   :  { %247 = vrot.lane.b32.xlu1 %v1404_v7, %s1349_s15 }
 0x29a   :  { %v240_v26 = vpop.permute.xlu0 %239 }
 0x29b   :  { %v244_v30 = vmul.f32 %v240_v26, %v234_v27 }
 0x2df   :  { %v238_v22 = vpop.permute.xlu1 %237 }
 0x2e0   :  { %v243_v24 = vmul.f32 %v238_v22, %v233_v21  ;;  %v730_v21 = vld [vmem:[#allocation3 + $0xa8] sm:$0xff]  ;;  %v718_v22 = vpop.f32.mrf.mxu0 }
 0x2e1   :  { %763 = vmatpush.msra.mxu1 %v730_v21 }
 0x2e2   :  { %v1448_v25 = vadd.f32 %v251_v23, %v243_v24  ;;  %v719_v23 = vadd.f32 %v718_v22, %v679_v19  ;;  %v680_v24 = vld [vmem:[#allocation3 + $0x90] sm:$0xff] }
 0x2e4   :  { %269 = vrot.lane.b32.xlu2 %v1448_v25, %s1353_s5  ;;  %1205 = vmatmul.msk.f32.vlgmr.msra.gmra.mxu1 %vm62_vm1, %v719_v23 }
 0x2e7   :  { %v248_v29 = vpop.permute.xlu1 %247 }
 0x2e8   :  { %v252_v31 = vmul.f32 %v248_v29, %v209_v57  ;;  %v721_v26 = vpop.f32.mrf.mxu0  ;;  %v681_v29 = vld [vmem:[#allocation3 + $0x98] sm:$0xff] }
 0x2e9   :  { %v722_v27 = vadd.f32 %v721_v26, %v680_v24 }
 0x2ea   :  { %v1452_v32 = vadd.f32 %v252_v31, %v244_v30 }
 0x2ec   :  { %271 = vrot.lane.b32.xlu0 %v1452_v32, %s1353_s5  ;;  %1206 = vmatmul.msk.f32.gmra.mxu1 %vm62_vm1, %v722_v27 }
 0x2f0   :  { %v724_v30 = vpop.f32.mrf.mxu0 }
 0x2f1   :  { %v725_v31 = vadd.f32 %v724_v30, %v681_v29 }
 0x2f4   :  { %1207 = vmatmul.msk.f32.gmra.mxu1 %vm62_vm1, %v725_v31 }
 0x33e   :  { %v270_v7 = vpop.permute.xlu2 %269 }
 0x33f   :  { %1187 = vmatmul.msk.f32.vlgmr.msrb.gmra.mxu3 %vm59_vm0, %v270_v7 }
 0x35e   :  { %v272_v33 = vpop.permute.xlu0 %271 }
 0x35f   :  { %1188 = vmatmul.msk.f32.gmra.mxu3 %vm59_vm0, %v272_v33 }
 0x3c2   :  { %v294_v34 = vpop.f32.mrf.mxu3 }
 0x3c3   :  { %v295_v35 = vadd.f32 %v294_v34, %v1432_v42 }
 0x3c5   :  { %348 = vrot.lane.b32.xlu0 %v295_v35, %s1349_s15  ;;  %302 = vrot.lane.b32.xlu1 %v295_v35, %s1351_s28  ;;  %v682_v35 = vld [vmem:[#allocation3 + $0xa0] sm:$0xff] }
 0x3e2   :  { %v297_v36 = vpop.f32.mrf.mxu3 }
 0x3e3   :  { %v298_v37 = vadd.f32 %v297_v36, %v1420_v28  ;;  %v727_v36 = vpop.f32.mrf.mxu0 }
 0x3e5   :  { %304 = vrot.lane.b32.xlu2 %v298_v37, %s1351_s28  ;;  %350 = vrot.lane.b32.xlu1 %v298_v37, %s1349_s15  ;;  %v728_v37 = vadd.f32 %v727_v36, %v682_v35 }
 0x3e7   :  { %1208 = vmatmul.msk.f32.gmra.mxu1 %vm62_vm1, %v728_v37 }
 0x437   :  { %v303_v38 = vpop.permute.xlu1 %302  ;;  %v349_v1 = vpop.permute.xlu0 %348 }
 0x438   :  { %v308_v40 = vadd.f32 %v303_v38, %v1437_v60 }
 0x43a   :  { %v1189_v41 = vmul.f32 -1.442695, %v308_v40 }
 0x43c   :  { %1269 = vpow2.f32 %v1189_v41 }
 0x43f   :  { %v305_v43 = vpop.permute.xlu2 %304 }
 0x440   :  { %v309_v44 = vadd.f32 %v305_v43, %v1429_v39 }
 0x442   :  { %v1270_v46 = vpop.eup %1269  ;;  %v1190_v47 = vmul.f32 -1.442695, %v309_v44 }
 0x443   :  { %v316_v48 = vadd.f32 1.0, %v1270_v46 }
 0x444   :  { %1271 = vpow2.f32 %v1190_v47 }
 0x445   :  { %1273 = vrcp.f32 %v316_v48  ;;  %v329_v56 = vand.u32 2147483648, %v316_v48  ;;  %v327_v58 = vand.u32 2147483647, %v316_v48  ;;  %vm323_vm13 = vweird.f32 %v316_v48 }
 0x447   :  { %v330_v62 = vor.u32 1.1754944e-38, %v329_v56  ;;  %vm328_vm15 = vcmp.eq.f32.partialorder %v327_v58, 8.507059e+37  ;;  %v734_v56 = vld [vmem:[#allocation3 + $0xc8] sm:$0xff] }
 0x44a   :  { %v1272_v50 = vpop.eup %1271 }
 0x44b   :  { %v1274_v51 = vpop.eup %1273  ;;  %v317_v52 = vadd.f32 1.0, %v1272_v50 }
 0x44c   :  { %v319_v53 = vmul.f32 %v1274_v51, %v316_v48  ;;  %vm324_vm12 = vweird.f32 %v1274_v51 }
 0x44d   :  { %1275 = vrcp.f32 %v317_v52  ;;  %vm325_vm14 = vmor %vm323_vm13, %vm324_vm12  ;;  %v344_v5 = vand.u32 2147483648, %v317_v52  ;;  %v342_v8 = vand.u32 2147483647, %v317_v52  ;;  %vm338_vm4 = vweird.f32 %v317_v52 }
 0x44e   :  { %v320_v54 = vsub.f32 1.0, %v319_v53  ;;  %v733_v53 = vld [vmem:[#allocation3 + $0xc0] sm:$0xff] }
 0x44f   :  { %v345_v10 = vor.u32 1.1754944e-38, %v344_v5  ;;  %vm343_vm6 = vcmp.eq.f32.partialorder %v342_v8, 8.507059e+37 }
 0x450   :  { %v321_v57 = vmul.f32 %v1274_v51, %v320_v54 }
 0x452   :  { %v322_v59 = vadd.f32 %v1274_v51, %v321_v57 }
 0x453   :  { %v1276_v61 = vpop.eup %1275 }
 0x454   :  { %v334_v63 = vmul.f32 %v1276_v61, %v317_v52  ;;  %v326_v0 = vsel %vm325_vm14, %v1274_v51, %v322_v59  ;;  %vm339_vm2 = vweird.f32 %v1276_v61  ;;  %v765_v52 = vpop.f32.mrf.mxu1 }
 0x455   :  { %v331_v2 = vsel %vm328_vm15, %v330_v62, %v326_v0  ;;  %vm340_vm5 = vmor %vm338_vm4, %vm339_vm2  ;;  %v732_v0 = vld [vmem:[#allocation3 + $0xb8] sm:$0xff] }
 0x456   :  { %v335_v3 = vsub.f32 1.0, %v334_v63  ;;  %v354_v4 = vmul.f32 %v349_v1, %v331_v2  ;;  %v368_v40 = vsub.f32 1.0, %v331_v2  ;;  %v1505_v1 = vadd.f32 %v765_v52, %v732_v0 }
 0x457   :  { %v351_v13 = vpop.permute.xlu1 %350 }
 0x458   :  { %v336_v6 = vmul.f32 %v1276_v61, %v335_v3  ;;  %358 = vrot.lane.b32.xlu2 %v354_v4, %s1350_s21 }
 0x45a   :  { %v337_v9 = vadd.f32 %v1276_v61, %v336_v6 }
 0x45c   :  { %v341_v11 = vsel %vm340_vm5, %v1276_v61, %v337_v9  ;;  %v768_v54 = vpop.f32.mrf.mxu1  ;;  %v735_v61 = vld [vmem:[#allocation3 + $0xd0] sm:$0xff] }
 0x45d   :  { %v346_v12 = vsel %vm343_vm6, %v345_v10, %v341_v11  ;;  %v1492_v55 = vadd.f32 %v768_v54, %v733_v53 }
 0x45e   :  { %v355_v14 = vmul.f32 %v351_v13, %v346_v12  ;;  %v369_v47 = vsub.f32 1.0, %v346_v12 }
 0x460   :  { %380 = vrot.lane.b32.xlu2 %v1448_v25, %s1351_s28  ;;  %360 = vrot.lane.b32.xlu0 %v355_v14, %s1350_s21 }
 0x464   :  { %v771_v57 = vpop.f32.mrf.mxu1 }
 0x465   :  { %v1496_v58 = vadd.f32 %v771_v57, %v734_v56 }
 0x46c   :  { %v774_v62 = vpop.f32.mrf.mxu1 }
 0x46d   :  { %v1501_v63 = vadd.f32 %v774_v62, %v735_v61 }
 0x4b2   :  { %v359_v16 = vpop.permute.xlu2 %358 }
 0x4b3   :  { %v364_v17 = vadd.f32 %v359_v16, %v1437_v60 }
 0x4b5   :  { %1277 = vtanh.f32 %v364_v17 }
 0x4ba   :  { %v381_v38 = vpop.permute.xlu2 %380 }
 0x4bb   :  { %v1278_v18 = vpop.eup %1277  ;;  %v386_v43 = vmul.f32 %v381_v38, %v331_v2 }
 0x4bc   :  { %372 = vrot.lane.b32.xlu1 %v1278_v18, %s1353_s5 }
 0x4c4   :  { %382 = vrot.lane.b32.xlu1 %v1452_v32, %s1351_s28 }
 0x4cc   :  { %787 = vrot.lane.b32.xlu1 %v1501_v63, %s1352_s0 }
 0x4d2   :  { %v361_v7 = vpop.permute.xlu0 %360 }
 0x4d3   :  { %v365_v33 = vadd.f32 %v361_v7, %v1429_v39 }
 0x4d4   :  { %781 = vrot.lane.b32.xlu1 %v1505_v1, %s1352_s0 }
 0x4d5   :  { %1279 = vtanh.f32 %v365_v33  ;;  %v838_v33 = vld [vmem:[#allocation3 + $0x108] sm:$0xff] }
 0x4db   :  { %v1280_v34 = vpop.eup %1279 }
 0x4dc   :  { %374 = vrot.lane.b32.xlu0 %v1280_v34, %s1353_s5 }
 0x52e   :  { %v373_v41 = vpop.permute.xlu1 %372 }
 0x52f   :  { %v378_v44 = vmul.f32 %v373_v41, %v368_v40 }
 0x531   :  { %v1484_v45 = vadd.f32 %v386_v43, %v378_v44 }
 0x533   :  { %405 = vrot.lane.b32.xlu2 %v1484_v45, %s1354_s6 }
 0x536   :  { %v383_v46 = vpop.permute.xlu1 %382 }
 0x537   :  { %v387_v49 = vmul.f32 %v383_v46, %v346_v12 }
 0x53b   :  { %785 = vrot.lane.b32.xlu2 %v1496_v58, %s1352_s0 }
 0x53e   :  { %v788_v3 = vpop.permute.xlu1 %787 }
 0x53f   :  { %1209 = vmatpush.xpose.msk.msra.mxu2 %vm62_vm1, %v788_v3 }
 0x546   :  { %v782_v9 = vpop.permute.xlu1 %781 }
 0x54e   :  { %v375_v48 = vpop.permute.xlu0 %374 }
 0x54f   :  { %v379_v50 = vmul.f32 %v375_v48, %v369_v47 }
 0x551   :  { %v1488_v51 = vadd.f32 %v387_v49, %v379_v50 }
 0x553   :  { %407 = vrot.lane.b32.xlu0 %v1488_v51, %s1354_s6 }
 0x55b   :  { %783 = vrot.lane.b32.xlu0 %v1492_v55, %s1352_s0 }
 0x58d   :  { %v406_v59 = vpop.permute.xlu2 %405 }
 0x58e   :  { %1191 = vmatmul.msk.f32.vlgmr.msrb.gmra.mxu2 %vm59_vm0, %v406_v59 }
 0x595   :  { %v786_v4 = vpop.permute.xlu2 %785 }
 0x596   :  { %1210 = vmatpush.xpose.msk.msra.mxu2 %vm62_vm1, %v786_v4 }
 0x5c5   :  { %v408_v2 = vpop.permute.xlu0 %407 }
 0x5c6   :  { %1192 = vmatmul.msk.f32.gmra.mxu2 %vm59_vm0, %v408_v2 }
 0x5cd   :  { %v784_v5 = vpop.permute.xlu0 %783 }
 0x5ce   :  { %1211 = vmatpush.xpose.msk.msra.mxu2 %vm62_vm1, %v784_v5  ;;  %v840_v5 = vld [vmem:[#allocation3 + $0x118] sm:$0xff] }
 0x5d2   :  { %1212 = vmatpush.xpose.msk.msra.mxu2 %vm62_vm1, %v782_v9 }
 0x5d5   :  { %1213 = vmatmul.msk.f32.vlgmr.msra.gmra.mxu2 %vm62_vm1, %v1505_v1 }
 0x5dd   :  { %1214 = vmatmul.msk.f32.gmra.mxu2 %vm62_vm1, %v1492_v55 }
 0x5e5   :  { %1215 = vmatmul.msk.f32.gmra.mxu2 %vm62_vm1, %v1496_v58 }
 0x5ed   :  { %1216 = vmatmul.msk.f32.gmra.mxu2 %vm62_vm1, %v1501_v63 }
 0x611   :  { %v430_v6 = vpop.f32.mrf.mxu2 }
 0x612   :  { %v431_v8 = vadd.f32 %v430_v6, %v1432_v42 }
 0x614   :  { %438 = vrot.lane.b32.xlu2 %v431_v8, %s1355_s7  ;;  %484 = vrot.lane.b32.xlu1 %v431_v8, %s1356_s8 }
 0x649   :  { %v433_v10 = vpop.f32.mrf.mxu2 }
 0x64a   :  { %v434_v11 = vadd.f32 %v433_v10, %v1420_v28 }
 0x64c   :  { %486 = vrot.lane.b32.xlu2 %v434_v11, %s1356_s8  ;;  %440 = vrot.lane.b32.xlu0 %v434_v11, %s1355_s7 }
 0x658   :  { %v822_v31 = vpop.f32.mrf.mxu2 }
 0x659   :  { %v834_v7 = vmul.f32 0.25, %v822_v31 }
 0x65b   :  { %v842_v34 = vadd.f32 %v838_v33, %v834_v7  ;;  %v839_v7 = vld [vmem:[#allocation3 + $0x110] sm:$0xff] }
 0x65d   :  { %v846_v36 = vsel %vm107_vm3, %v842_v34, -inf }
 0x660   :  { %v825_v0 = vpop.f32.mrf.mxu2 }
 0x661   :  { %v835_v31 = vmul.f32 0.25, %v825_v0 }
 0x663   :  { %v843_v33 = vadd.f32 %v839_v7, %v835_v31 }
 0x668   :  { %v828_v2 = vpop.f32.mrf.mxu2 }
 0x669   :  { %v836_v4 = vmul.f32 0.25, %v828_v2 }
 0x66b   :  { %v1538_v8 = vadd.f32 %v840_v5, %v836_v4 }
 0x66e   :  { %v439_v12 = vpop.permute.xlu2 %438 }
 0x66f   :  { %v444_v13 = vadd.f32 %v439_v12, %v1437_v60  ;;  %v852_v12 = vsel %vm107_vm3, %v1538_v8, -inf }
 0x670   :  { %v831_v9 = vpop.f32.mrf.mxu2 }
 0x671   :  { %v1193_v14 = vmul.f32 -1.442695, %v444_v13  ;;  %v837_v11 = vmul.f32 0.25, %v831_v9  ;;  %v841_v13 = vld [vmem:[#allocation3 + $0x120] sm:$0xff] }
 0x673   :  { %1281 = vpow2.f32 %v1193_v14 }
 0x679   :  { %v1282_v15 = vpop.eup %1281 }
 0x67a   :  { %v452_v16 = vadd.f32 1.0, %v1282_v15  ;;  %v845_v15 = vadd.f32 %v841_v13, %v837_v11 }
 0x67c   :  { %1283 = vrcp.f32 %v452_v16  ;;  %v465_v20 = vand.u32 2147483648, %v452_v16  ;;  %v463_v22 = vand.u32 2147483647, %v452_v16  ;;  %vm459_vm8 = vweird.f32 %v452_v16 }
 0x67e   :  { %v466_v24 = vor.u32 1.1754944e-38, %v465_v20  ;;  %vm464_vm10 = vcmp.eq.f32.partialorder %v463_v22, 8.507059e+37 }
 0x682   :  { %v1284_v17 = vpop.eup %1283 }
 0x683   :  { %v455_v18 = vmul.f32 %v1284_v17, %v452_v16  ;;  %vm460_vm7 = vweird.f32 %v1284_v17  ;;  %v855_v16 = vsel %vm107_vm3, %v845_v15, -inf }
 0x684   :  { %vm461_vm9 = vmor %vm459_vm8, %vm460_vm7 }
 0x685   :  { %v456_v19 = vsub.f32 1.0, %v455_v18 }
 0x686   :  { %v485_v29 = vpop.permute.xlu1 %484 }
 0x687   :  { %v457_v21 = vmul.f32 %v1284_v17, %v456_v19 }
 0x689   :  { %v458_v23 = vadd.f32 %v1284_v17, %v457_v21 }
 0x68b   :  { %v462_v26 = vsel %vm461_vm9, %v1284_v17, %v458_v23 }
 0x68c   :  { %v1525_v27 = vsel %vm464_vm10, %v466_v24, %v462_v26 }
 0x68d   :  { %v490_v30 = vmul.f32 %v485_v29, %v1525_v27  ;;  %v504_v22 = vsub.f32 1.0, %v1525_v27 }
 0x68f   :  { %494 = vrot.lane.b32.xlu0 %v490_v30, %s1350_s21  ;;  %v1247_v30 = vpack.i.bf16 %v1496_v58, %v1501_v63 }
 0x697   :  { %516 = vrot.lane.b32.xlu0 %v1484_v45, %s1351_s28 }
 0x6a6   :  { %v487_v54 = vpop.permute.xlu2 %486 }
 0x6be   :  { %v441_v35 = vpop.permute.xlu0 %440 }
 0x6bf   :  { %v445_v37 = vadd.f32 %v441_v35, %v1429_v39 }
 0x6c1   :  { %v1194_v38 = vmul.f32 -1.442695, %v445_v37  ;;  %847 = vmax.xlane.f32.xlu0 %v846_v36 }
 0x6c3   :  { %1285 = vpow2.f32 %v1194_v38 }
 0x6c9   :  { %v1286_v40 = vpop.eup %1285 }
 0x6ca   :  { %v453_v41 = vadd.f32 1.0, %v1286_v40 }
 0x6cc   :  { %1287 = vrcp.f32 %v453_v41  ;;  %v480_v47 = vand.u32 2147483648, %v453_v41  ;;  %v478_v49 = vand.u32 2147483647, %v453_v41  ;;  %vm474_vm12 = vweird.f32 %v453_v41 }
 0x6ce   :  { %v481_v52 = vor.u32 1.1754944e-38, %v480_v47  ;;  %vm479_vm14 = vcmp.eq.f32.partialorder %v478_v49, 8.507059e+37  ;;  %v1252_v47 = vpack.i.bf16 %v1505_v1, %v1492_v55 }
 0x6d2   :  { %v1288_v43 = vpop.eup %1287 }
 0x6d3   :  { %v470_v44 = vmul.f32 %v1288_v43, %v453_v41  ;;  %vm475_vm11 = vweird.f32 %v1288_v43 }
 0x6d4   :  { %vm476_vm13 = vmor %vm474_vm12, %vm475_vm11 }
 0x6d5   :  { %v471_v46 = vsub.f32 1.0, %v470_v44 }
 0x6d7   :  { %v472_v48 = vmul.f32 %v1288_v43, %v471_v46 }
 0x6d9   :  { %v473_v50 = vadd.f32 %v1288_v43, %v472_v48 }
 0x6db   :  { %v477_v53 = vsel %vm476_vm13, %v1288_v43, %v473_v50 }
 0x6dc   :  { %v482_v56 = vsel %vm479_vm14, %v481_v52, %v477_v53 }
 0x6dd   :  { %v491_v57 = vmul.f32 %v487_v54, %v482_v56  ;;  %v505_v58 = vsub.f32 1.0, %v482_v56 }
 0x6df   :  { %496 = vrot.lane.b32.xlu1 %v491_v57, %s1350_s21 }
 0x701   :  { %v495_v59 = vpop.permute.xlu0 %494 }
 0x702   :  { %v500_v61 = vadd.f32 %v495_v59, %v1437_v60 }
 0x704   :  { %1289 = vtanh.f32 %v500_v61 }
 0x709   :  { %v517_v3 = vpop.permute.xlu0 %516 }
 0x70a   :  { %v1290_v62 = vpop.eup %1289  ;;  %v522_v24 = vmul.f32 %v517_v3, %v1525_v27 }
 0x70b   :  { %508 = vrot.lane.b32.xlu2 %v1290_v62, %s1353_s5 }
 0x713   :  { %518 = vrot.lane.b32.xlu2 %v1488_v51, %s1351_s28 }
 0x734   :  { %v848_v6 = vpop.xlane.xlu0 %847 }
 0x735   :  { %v858_v10 = vsub.f32 %v842_v34, %v848_v6  ;;  %v849_v34 = vsel %vm107_vm3, %v843_v33, -inf }
 0x737   :  { %v862_v14 = vmul.f32 1.442695, %v858_v10 }
 0x739   :  { %1291 = vpow2.f32 %v862_v14 }
 0x73c   :  { %853 = vmax.xlane.f32.xlu2 %v852_v12 }
 0x73f   :  { %v1543_v17 = vpop.eup %1291 }
 0x740   :  { %v870_v18 = vsel %vm107_vm3, %v1543_v17, 0.0 }
 0x744   :  { %856 = vmax.xlane.f32.xlu2 %v855_v16 }
 0x74c   :  { %871 = vadd.xlane.f32.xlu2 %v870_v18 }
 0x751   :  { %v497_v19 = vpop.permute.xlu1 %496 }
 0x752   :  { %v501_v20 = vadd.f32 %v497_v19, %v1429_v39 }
 0x754   :  { %1293 = vtanh.f32 %v501_v20 }
 0x75a   :  { %v1294_v21 = vpop.eup %1293 }
 0x75b   :  { %510 = vrot.lane.b32.xlu1 %v1294_v21, %s1353_s5 }
 0x765   :  { %v509_v23 = vpop.permute.xlu2 %508 }
 0x766   :  { %v514_v26 = vmul.f32 %v509_v23, %v504_v22 }
 0x768   :  { %v1551_v29 = vadd.f32 %v522_v24, %v514_v26 }
 0x76a   :  { %541 = vrot.lane.b32.xlu0 %v1551_v29, %s1357_s9 }
 0x76d   :  { %v519_v35 = vpop.permute.xlu2 %518 }
 0x76e   :  { %v523_v43 = vmul.f32 %v519_v35, %v482_v56 }
 0x772   :  { %1248 = vrot.lane.b32.xlu0 %v1247_v30, %s1354_s6 }
 0x785   :  { %850 = vmax.xlane.f32.xlu1 %v849_v34 }
 0x7af   :  { %v854_v27 = vpop.xlane.xlu2 %853 }
 0x7b0   :  { %v860_v56 = vsub.f32 %v1538_v8, %v854_v27 }
 0x7b2   :  { %v866_v59 = vmul.f32 1.442695, %v860_v56 }
 0x7b7   :  { %v857_v36 = vpop.xlane.xlu2 %856 }
 0x7b8   :  { %v861_v37 = vsub.f32 %v845_v15, %v857_v36 }
 0x7ba   :  { %v868_v38 = vmul.f32 1.442695, %v861_v37 }
 0x7bc   :  { %1295 = vpow2.f32 %v868_v38 }
 0x7bf   :  { %v872_v0 = vpop.xlane.xlu2 %871 }
 0x7c0   :  { %v893_v9 = vand.u32 2147483648, %v872_v0  ;;  %vm887_vm2 = vweird.f32 %v872_v0  ;;  %v891_v10 = vand.u32 2147483647, %v872_v0 }
 0x7c2   :  { %v1559_v40 = vpop.eup %1295  ;;  %v894_v12 = vor.u32 1.1754944e-38, %v893_v9  ;;  %vm892_vm5 = vcmp.eq.f32.partialorder %v891_v10, 8.507059e+37 }
 0x7c3   :  { %v879_v41 = vsel %vm107_vm3, %v1559_v40, 0.0 }
 0x7c4   :  { %880 = vadd.xlane.f32.xlu0 %v879_v41 }
 0x7cd   :  { %v511_v63 = vpop.permute.xlu1 %510 }
 0x7ce   :  { %v515_v44 = vmul.f32 %v511_v63, %v505_v58 }
 0x7d0   :  { %v1563_v46 = vadd.f32 %v523_v43, %v515_v44 }
 0x7d2   :  { %543 = vrot.lane.b32.xlu1 %v1563_v46, %s1357_s9 }
 0x7da   :  { %1253 = vrot.lane.b32.xlu1 %v1252_v47, %s1354_s6 }
 0x7dc   :  { %v542_v48 = vpop.permute.xlu0 %541 }
 0x7dd   :  { %1195 = vmatmul.msk.f32.vlgmr.msra.gmra.mxu3 %vm59_vm0, %v542_v48 }
 0x7e4   :  { %v1249_v49 = vpop.permute.xlu0 %1248 }
 0x7e5   :  { %v1250_v50 = vunpack.i.l.bf16 %v1249_v49  ;;  %v1251_v52 = vunpack.i.h.bf16 %v1249_v49 }
 0x7e7   :  { %978 = vmatpush.msrb.mxu3 %v1250_v50 }
 0x7e9   :  { %979 = vmatpush.msrb.mxu3 %v1251_v52 }
 0x7f8   :  { %v851_v53 = vpop.xlane.xlu1 %850 }
 0x7f9   :  { %v859_v54 = vsub.f32 %v843_v33, %v851_v53 }
 0x7fb   :  { %v864_v57 = vmul.f32 1.442695, %v859_v54 }
 0x7fd   :  { %1297 = vpow2.f32 %v864_v57 }
 0x7fe   :  { %1299 = vpow2.f32 %v866_v59 }
 0x7ff   :  { %1301 = vrcp.f32 %v872_v0 }
 0x803   :  { %v1298_v61 = vpop.eup %1297 }
 0x804   :  { %v873_v55 = vsel %vm107_vm3, %v1298_v61, 0.0  ;;  %v1573_v1 = vpop.eup %1299 }
 0x805   :  { %874 = vadd.xlane.f32.xlu2 %v873_v55  ;;  %v876_v62 = vsel %vm107_vm3, %v1573_v1, 0.0  ;;  %v1302_v2 = vpop.eup %1301 }
 0x806   :  { %v883_v3 = vmul.f32 %v1302_v2, %v872_v0  ;;  %vm888_vm15 = vweird.f32 %v1302_v2 }
 0x807   :  { %vm889_vm4 = vmor %vm887_vm2, %vm888_vm15 }
 0x808   :  { %v884_v4 = vsub.f32 1.0, %v883_v3  ;;  %v995_v3 = vld [vmem:[#allocation3 + $0xd8] sm:$0xff] }
 0x80a   :  { %v885_v5 = vmul.f32 %v1302_v2, %v884_v4 }
 0x80c   :  { %v886_v8 = vadd.f32 %v1302_v2, %v885_v5 }
 0x80d   :  { %877 = vadd.xlane.f32.xlu2 %v876_v62 }
 0x80e   :  { %v890_v11 = vsel %vm889_vm4, %v1302_v2, %v886_v8  ;;  %v996_v2 = vld [vmem:[#allocation3 + $0xe0] sm:$0xff] }
 0x80f   :  { %v895_v14 = vsel %vm892_vm5, %v894_v12, %v890_v11  ;;  %1027 = vmatpush.msra.mxu0 %v996_v2 }
 0x810   :  { %v896_v18 = vmul.f32 %v1543_v17, %v895_v14 }
 0x811   :  { %1028 = vmatpush.msra.mxu0 %v995_v3  ;;  %v998_v3 = vld [vmem:[#allocation3 + $0xf0] sm:$0xff] }
 0x837   :  { %v881_v21 = vpop.xlane.xlu0 %880 }
 0x838   :  { %v938_v54 = vand.u32 2147483648, %v881_v21  ;;  %vm932_vm15 = vweird.f32 %v881_v21  ;;  %v936_v59 = vand.u32 2147483647, %v881_v21 }
 0x83a   :  { %v939_v55 = vor.u32 1.1754944e-38, %v938_v54  ;;  %vm937_vm4 = vcmp.eq.f32.partialorder %v936_v59, 8.507059e+37 }
 0x844   :  { %v544_v6 = vpop.permute.xlu1 %543 }
 0x845   :  { %1196 = vmatmul.msk.f32.gmra.mxu3 %vm59_vm0, %v544_v6 }
 0x84c   :  { %v1254_v13 = vpop.permute.xlu1 %1253 }
 0x84d   :  { %v1255_v15 = vunpack.i.l.bf16 %v1254_v13  ;;  %v1256_v16 = vunpack.i.h.bf16 %v1254_v13 }
 0x84f   :  { %980 = vmatpush.msrb.mxu3 %v1255_v15 }
 0x851   :  { %981 = vmatpush.msrb.mxu3 %v1256_v16 }
 0x852   :  { %1217 = vmatmul.msk.f32.vlgmr.msrb.gmra.mxu3 %vm107_vm3, %v896_v18 }
 0x860   :  { %v566_v19 = vpop.f32.mrf.mxu3 }
 0x861   :  { %v1581_v20 = vadd.f32 %v566_v19, %v1432_v42 }
 0x863   :  { %574 = vrot.lane.b32.xlu2 %v1581_v20, %s1357_s9 }
 0x878   :  { %v875_v22 = vpop.xlane.xlu2 %874 }
 0x879   :  { %1303 = vrcp.f32 %v875_v22  ;;  %v908_v31 = vand.u32 2147483648, %v875_v22  ;;  %v906_v34 = vand.u32 2147483647, %v875_v22  ;;  %vm902_vm7 = vweird.f32 %v875_v22 }
 0x87a   :  { %1305 = vrcp.f32 %v881_v21 }
 0x87b   :  { %v909_v27 = vor.u32 1.1754944e-38, %v908_v31  ;;  %vm907_vm9 = vcmp.eq.f32.partialorder %v906_v34, 8.507059e+37 }
 0x87f   :  { %v1304_v23 = vpop.eup %1303 }
 0x880   :  { %v898_v24 = vmul.f32 %v1304_v23, %v875_v22  ;;  %v878_v26 = vpop.xlane.xlu2 %877  ;;  %v1306_v30 = vpop.eup %1305  ;;  %vm903_vm6 = vweird.f32 %v1304_v23 }
 0x881   :  { %1307 = vrcp.f32 %v878_v26  ;;  %v928_v7 = vmul.f32 %v1306_v30, %v881_v21  ;;  %vm904_vm8 = vmor %vm902_vm7, %vm903_vm6  ;;  %v923_v43 = vand.u32 2147483648, %v878_v26  ;;  %v921_v48 = vand.u32 2147483647, %v878_v26 }
 0x882   :  { %v899_v17 = vsub.f32 1.0, %v898_v24  ;;  %vm917_vm11 = vweird.f32 %v878_v26  ;;  %vm933_vm14 = vweird.f32 %v1306_v30 }
 0x883   :  { %v929_v36 = vsub.f32 1.0, %v928_v7  ;;  %v924_v50 = vor.u32 1.1754944e-38, %v923_v43  ;;  %vm922_vm13 = vcmp.eq.f32.partialorder %v921_v48, 8.507059e+37  ;;  %vm934_vm2 = vmor %vm932_vm15, %vm933_vm14  ;;  %v526_v48 = vmax.f32 %v1551_v29, 0.0 }
 0x884   :  { %v900_v33 = vmul.f32 %v1304_v23, %v899_v17  ;;  %vm672_vm14 = vcmask 261312  }
 0x885   :  { %v930_v44 = vmul.f32 %v1306_v30, %v929_v36 }
 0x886   :  { %v901_v42 = vadd.f32 %v1304_v23, %v900_v33 }
 0x887   :  { %v1308_v35 = vpop.eup %1307  ;;  %v931_v53 = vadd.f32 %v1306_v30, %v930_v44 }
 0x888   :  { %v913_v37 = vmul.f32 %v1308_v35, %v878_v26  ;;  %v905_v38 = vsel %vm904_vm8, %v1304_v23, %v901_v42  ;;  %vm918_vm10 = vweird.f32 %v1308_v35 }
 0x889   :  { %v910_v41 = vsel %vm907_vm9, %v909_v27, %v905_v38  ;;  %vm919_vm12 = vmor %vm917_vm11, %vm918_vm10 }
 0x88a   :  { %v914_v58 = vsub.f32 1.0, %v913_v37  ;;  %v911_v63 = vmul.f32 %v1298_v61, %v910_v41  ;;  %v935_v61 = vsel %vm934_vm2, %v1306_v30, %v931_v53 }
 0x88b   :  { %v940_v62 = vsel %vm937_vm4, %v939_v55, %v935_v61  ;;  %v997_v55 = vld [vmem:[#allocation3 + $0xe8] sm:$0xff] }
 0x88c   :  { %v915_v47 = vmul.f32 %v1308_v35, %v914_v58  ;;  %1218 = vmatmul.msk.f32.gmra.mxu3 %vm107_vm3, %v911_v63  ;;  %v941_v0 = vmul.f32 %v1559_v40, %v940_v62 }
 0x88e   :  { %v916_v49 = vadd.f32 %v1308_v35, %v915_v47  ;;  %v255_v47 = vmax.f32 %v1448_v25, 0.0  ;;  %v390_v25 = vmax.f32 %v1484_v45, 0.0 }
 0x890   :  { %v920_v52 = vsel %vm919_vm12, %v1308_v35, %v916_v49  ;;  %v256_v49 = vmax.f32 %v1452_v32, 0.0  ;;  %vm400_vm12 = vcmask 130112  }
 0x891   :  { %v925_v56 = vsel %vm922_vm13, %v924_v50, %v920_v52  ;;  %vm536_vm13 = vcmask 195712  }
 0x892   :  { %v926_v57 = vmul.f32 %v1573_v1, %v925_v56 }
 0x894   :  { %1219 = vmatmul.msk.f32.gmra.mxu3 %vm107_vm3, %v926_v57  ;;  %v391_v57 = vmax.f32 %v1488_v51, 0.0 }
 0x89c   :  { %1220 = vmatmul.msk.f32.gmra.mxu3 %vm107_vm3, %v941_v0 }
 0x8bd   :  { %v575_v40 = vpop.permute.xlu2 %574 }
 0x8be   :  { %v580_v8 = vadd.f32 %v575_v40, %v1437_v60 }
 0x8c0   :  { %v1197_v10 = vmul.f32 -1.442695, %v580_v8 }
 0x8c2   :  { %1309 = vpow2.f32 %v1197_v10 }
 0x8c8   :  { %v569_v4 = vpop.f32.mrf.mxu3  ;;  %v1310_v11 = vpop.eup %1309 }
 0x8c9   :  { %v570_v5 = vadd.f32 %v569_v4, %v1420_v28  ;;  %v588_v12 = vadd.f32 1.0, %v1310_v11 }
 0x8cb   :  { %576 = vrot.lane.b32.xlu1 %v570_v5, %s1357_s9  ;;  %1311 = vrcp.f32 %v588_v12  ;;  %v601_v21 = vand.u32 2147483648, %v588_v12  ;;  %vm595_vm6 = vweird.f32 %v588_v12  ;;  %v599_v23 = vand.u32 2147483647, %v588_v12 }
 0x8cd   :  { %v602_v26 = vor.u32 1.1754944e-38, %v601_v21 }
 0x8d1   :  { %v1312_v13 = vpop.eup %1311 }
 0x8d2   :  { %v591_v14 = vmul.f32 %v1312_v13, %v588_v12  ;;  %vm596_vm5 = vweird.f32 %v1312_v13  ;;  %v1000_v12 = vld [vmem:[#allocation3 + $0x100] sm:$0xff] }
 0x8d3   :  { %620 = vrot.lane.b32.xlu1 %v1581_v20, %s1358_s10  ;;  %vm597_vm7 = vmor %vm595_vm6, %vm596_vm5 }
 0x8d4   :  { %v592_v15 = vsub.f32 1.0, %v591_v14 }
 0x8d5   :  { %v983_v1 = vpop.f32.mrf.mxu3 }
 0x8d6   :  { %1221 = vmatmul.msk.f32.vlgmr.msra.gmra.mxu0 %vm62_vm1, %v983_v1  ;;  %v593_v16 = vmul.f32 %v1312_v13, %v592_v15  ;;  %v1083_v15 = vld [vmem:[#allocation3 + $0x160] sm:$0xff] }
 0x8d7   :  { %1102 = vmatpush.msrb.mxu1 %v1083_v15 }
 0x8d8   :  { %v594_v20 = vadd.f32 %v1312_v13, %v593_v16  ;;  %v1082_v16 = vld [vmem:[#allocation3 + $0x158] sm:$0xff] }
 0x8d9   :  { %1103 = vmatpush.msrb.mxu1 %v1082_v16 }
 0x8da   :  { %v598_v24 = vsel %vm597_vm7, %v1312_v13, %v594_v20  ;;  %v1080_v20 = vld [vmem:[#allocation3 + $0x148] sm:$0xff] }
 0x8db   :  { %622 = vrot.lane.b32.xlu1 %v570_v5, %s1358_s10 }
 0x90f   :  { %v986_v6 = vpop.f32.mrf.mxu3 }
 0x910   :  { %1222 = vmatmul.msk.f32.gmra.mxu0 %vm62_vm1, %v986_v6 }
 0x917   :  { %v989_v9 = vpop.f32.mrf.mxu3 }
 0x918   :  { %1223 = vmatmul.msk.f32.gmra.mxu0 %vm62_vm1, %v989_v9  ;;  %v999_v9 = vld [vmem:[#allocation3 + $0xf8] sm:$0xff] }
 0x91f   :  { %v992_v28 = vpop.f32.mrf.mxu3 }
 0x920   :  { %1224 = vmatmul.msk.f32.gmra.mxu0 %vm62_vm1, %v992_v28  ;;  %vm600_vm1 = vcmp.eq.f32.partialorder %v599_v23, 8.507059e+37  ;;  %v527_v28 = vmax.f32 %v1563_v46, 0.0 }
 0x921   :  { %v1599_v30 = vsel %vm600_vm1, %v602_v26, %v598_v24  ;;  %v1077_v24 = vld [vmem:[#allocation3 + $0x140] sm:$0xff]  ;;  %v1076_v26 = vld [vmem:[#allocation3 + $0x138] sm:$0xff] }
 0x922   :  { %v640_v0 = vsub.f32 1.0, %v1599_v30  ;;  %1131 = vmatpush.msrb.mxu2 %v1077_v24 }
 0x924   :  { %1132 = vmatpush.msrb.mxu2 %v1076_v26 }
 0x93d   :  { %v577_v18 = vpop.permute.xlu1 %576 }
 0x93e   :  { %v581_v19 = vadd.f32 %v577_v18, %v1429_v39  ;;  %v1081_v18 = vld [vmem:[#allocation3 + $0x150] sm:$0xff] }
 0x93f   :  { %1104 = vmatpush.msrb.mxu1 %v1081_v18 }
 0x940   :  { %v1198_v22 = vmul.f32 -1.442695, %v581_v19 }
 0x941   :  { %1105 = vmatpush.msrb.mxu1 %v1080_v20 }
 0x942   :  { %1313 = vpow2.f32 %v1198_v22 }
 0x945   :  { %v621_v17 = vpop.permute.xlu1 %620 }
 0x946   :  { %v626_v31 = vmul.f32 %v621_v17, %v1599_v30  ;;  %v1075_v17 = vld [vmem:[#allocation3 + $0x130] sm:$0xff] }
 0x947   :  { %1133 = vmatpush.msrb.mxu2 %v1075_v17 }
 0x948   :  { %v1314_v7 = vpop.eup %1313  ;;  %630 = vrot.lane.b32.xlu2 %v626_v31, %s1350_s21 }
 0x949   :  { %v589_v33 = vadd.f32 1.0, %v1314_v7  ;;  %v1074_v7 = vld [vmem:[#allocation3 + $0x128] sm:$0xff] }
 0x94a   :  { %1134 = vmatpush.msrb.mxu2 %v1074_v7 }
 0x94b   :  { %1315 = vrcp.f32 %v589_v33  ;;  %v616_v27 = vand.u32 2147483648, %v589_v33  ;;  %v614_v37 = vand.u32 2147483647, %v589_v33  ;;  %vm610_vm9 = vweird.f32 %v589_v33 }
 0x94d   :  { %v617_v41 = vor.u32 1.1754944e-38, %v616_v27  ;;  %vm615_vm11 = vcmp.eq.f32.partialorder %v614_v37, 8.507059e+37  ;;  %v623_v43 = vpop.permute.xlu1 %622 }
 0x951   :  { %v1316_v34 = vpop.eup %1315 }
 0x952   :  { %v606_v42 = vmul.f32 %v1316_v34, %v589_v33  ;;  %vm611_vm8 = vweird.f32 %v1316_v34 }
 0x953   :  { %vm612_vm10 = vmor %vm610_vm9, %vm611_vm8  ;;  %v1030_v61 = vpop.f32.mrf.mxu0 }
 0x954   :  { %v607_v35 = vsub.f32 1.0, %v606_v42  ;;  %v1031_v62 = vadd.f32 %v1030_v61, %v997_v55 }
 0x956   :  { %v608_v36 = vmul.f32 %v1316_v34, %v607_v35 }
 0x958   :  { %v609_v38 = vadd.f32 %v1316_v34, %v608_v36 }
 0x95a   :  { %v613_v58 = vsel %vm612_vm10, %v1316_v34, %v609_v38 }
 0x95b   :  { %v1603_v63 = vsel %vm615_vm11, %v617_v41, %v613_v58  ;;  %v1142_v58 = vld [vmem:[#allocation3 + $0x168] sm:$0xff] }
 0x95c   :  { %v627_v44 = vmul.f32 %v623_v43, %v1603_v63 }
 0x95e   :  { %632 = vrot.lane.b32.xlu1 %v627_v44, %s1350_s21 }
 0x966   :  { %652 = vrot.lane.b32.xlu1 %v1551_v29, %s1351_s28 }
 0x96e   :  { %259 = vrot.lane.b32.xlu1 %v255_v47, %s1353_s5 }
 0x976   :  { %530 = vrot.lane.b32.xlu1 %v526_v48, %s1359_s11  ;;  %v1143_v48 = vld [vmem:[#allocation3 + $0x170] sm:$0xff] }
 0x97e   :  { %261 = vrot.lane.b32.xlu1 %v256_v49, %s1353_s5 }
 0x9a2   :  { %v631_v50 = vpop.permute.xlu2 %630 }
 0x9a3   :  { %v636_v52 = vadd.f32 %v631_v50, %v1437_v60 }
 0x9a5   :  { %1317 = vtanh.f32 %v636_v52 }
 0x9ab   :  { %v1318_v53 = vpop.eup %1317 }
 0x9ac   :  { %644 = vrot.lane.b32.xlu2 %v1318_v53, %s1353_s5 }
 0x9b4   :  { %654 = vrot.lane.b32.xlu2 %v1563_v46, %s1351_s28  ;;  %v641_v46 = vsub.f32 1.0, %v1603_v63 }
 0x9bc   :  { %394 = vrot.lane.b32.xlu2 %v390_v25, %s1360_s12 }
 0x9d0   :  { %v633_v29 = vpop.permute.xlu1 %632 }
 0x9d1   :  { %v637_v32 = vadd.f32 %v633_v29, %v1429_v39  ;;  %v1033_v39 = vpop.f32.mrf.mxu0 }
 0x9d2   :  { %v1034_v1 = vadd.f32 %v1033_v39, %v998_v3 }
 0x9d3   :  { %1319 = vtanh.f32 %v637_v32 }
 0x9d8   :  { %v653_v54 = vpop.permute.xlu1 %652 }
 0x9d9   :  { %v1320_v56 = vpop.eup %1319  ;;  %v658_v4 = vmul.f32 %v653_v54, %v1599_v30  ;;  %v1036_v40 = vpop.f32.mrf.mxu0 }
 0x9da   :  { %646 = vrot.lane.b32.xlu0 %v1320_v56, %s1353_s5  ;;  %v1037_v10 = vadd.f32 %v1036_v40, %v999_v9 }
 0x9e0   :  { %v260_v60 = vpop.permute.xlu1 %259 }
 0x9e1   :  { %265 = vst.msk [vmem:[#allocation2] sm:$0xff] %vm59_vm0, %v260_v60  ;;  %v1039_v13 = vpop.f32.mrf.mxu0 }
 0x9e2   :  { %396 = vrot.lane.b32.xlu0 %v391_v57, %s1360_s12  ;;  %v1040_v14 = vadd.f32 %v1039_v13, %v1000_v12 }
 0x9e8   :  { %v531_v59 = vpop.permute.xlu1 %530 }
 0x9f0   :  { %v262_v45 = vpop.permute.xlu1 %261 }
 0x9f1   :  { %266 = vst.msk [vmem:[#allocation2 + $0x8] sm:$0xff] %vm59_vm0, %v262_v45 }
 0xa04   :  { %1042 = vxpose.xlu0.b32.start [1/4] (short) (narrow) %v1031_v62, 16 }
 0xa06   :  { %v645_v2 = vpop.permute.xlu2 %644 }
 0xa07   :  { %v650_v51 = vmul.f32 %v645_v2, %v640_v0 }
 0xa09   :  { %v660_v5 = vadd.f32 %v658_v4, %v650_v51 }
 0xa0b   :  { %v662_v6 = vmax.f32 %v660_v5, 0.0 }
 0xa0c   :  { %1043 = vxpose.xlu0.b32.cont [2/4] (short) (narrow) %v1034_v1, 16 }
 0xa0d   :  { %666 = vrot.lane.b32.xlu2 %v662_v6, %s1357_s9 }
 0xa0e   :  { %v655_v8 = vpop.permute.xlu2 %654 }
 0xa0f   :  { %v659_v21 = vmul.f32 %v655_v8, %v1603_v63 }
 0xa14   :  { %1044 = vxpose.xlu0.b32.cont [3/4] (short) (narrow) %v1037_v10, 16 }
 0xa15   :  { %532 = vrot.lane.b32.xlu2 %v527_v28, %s1359_s11 }
 0xa16   :  { %v395_v11 = vpop.permute.xlu2 %394 }
 0xa17   :  { %401 = vst.msk [vmem:[#allocation2] sm:$0xff] %vm400_vm12, %v395_v11 }
 0xa18   :  { %537 = vst.msk [vmem:[#allocation2] sm:$0xff] %vm536_vm13, %v531_v59 }
 0xa1c   :  { %1045 = vxpose.xlu0.b32.end [4/4] (short) (narrow) %v1040_v14, 16 }
 0xa4c   :  { %v647_v19 = vpop.permute.xlu0 %646 }
 0xa4d   :  { %v651_v22 = vmul.f32 %v647_v19, %v641_v46 }
 0xa4f   :  { %v661_v23 = vadd.f32 %v659_v21, %v651_v22 }
 0xa51   :  { %v663_v30 = vmax.f32 %v661_v23, 0.0 }
 0xa53   :  { %668 = vrot.lane.b32.xlu1 %v663_v30, %s1357_s9 }
 0xa54   :  { %v397_v31 = vpop.permute.xlu0 %396 }
 0xa55   :  { %402 = vst.msk [vmem:[#allocation2 + $0x8] sm:$0xff] %vm400_vm12, %v397_v31 }
 0xa67   :  { %v667_v33 = vpop.permute.xlu2 %666 }
 0xa68   :  { %673 = vst.msk [vmem:[#allocation2] sm:$0xff] %vm672_vm14, %v667_v33 }
 0xa6f   :  { %v533_v34 = vpop.permute.xlu2 %532  ;;  %v1078_v42 = vld [vmem:[#allocation2] sm:$0xff] }
 0xa70   :  { %538 = vst.msk [vmem:[#allocation2 + $0x8] sm:$0xff] %vm536_vm13, %v533_v34  ;;  %1225 = vmatmul.msk.f32.vlgmr.msrb.gmra.mxu1 %vm107_vm3, %v1078_v42 }
 0xaa8   :  { %v1058_v35 = vpop.trf.xlu0 }
 0xaa9   :  { %1227 = vmatmul.msk.f32.vlgmr.msrb.gmra.mxu2 %vm107_vm3, %v1058_v35 }
 0xab0   :  { %v1059_v27 = vpop.trf.xlu0 }
 0xab1   :  { %1228 = vmatmul.msk.f32.gmra.mxu2 %vm107_vm3, %v1059_v27 }
 0xac5   :  { %v669_v36 = vpop.permute.xlu1 %668 }
 0xac6   :  { %674 = vst.msk [vmem:[#allocation2 + $0x8] sm:$0xff] %vm672_vm14, %v669_v36 }
 0xacd   :  { %v1079_v37 = vld [vmem:[#allocation2 + $0x8] sm:$0xff] }
 0xace   :  { %1226 = vmatmul.msk.f32.gmra.mxu1 %vm107_vm3, %v1079_v37 }
 0xaed   :  { %v1107_v38 = vpop.f32.mrf.mxu1 }
 0xb2c   :  { %v1136_v41 = vpop.f32.mrf.mxu2 }
 0xb2d   :  { %v1137_v63 = vadd.f32 %v1136_v41, %v1107_v38 }
 0xb2f   :  { %v1144_v43 = vadd.f32 %v1142_v58, %v1137_v63 }
 0xb31   :  { %1146 = vst.msk [vmem:[%s1683_s2] sm:$0xff] %vm59_vm0, %v1144_v43  ;;  %1150 = vrot.lane.b32.xlu2 %v1144_v43, %s1353_s5 }
 0xb34   :  { %v1139_v44 = vpop.f32.mrf.mxu2 }
 0xb39   :  { %1158 = vrot.lane.b32.xlu2 %v1144_v43, %s1352_s0 }
 0xb41   :  { %1166 = vrot.lane.b32.xlu2 %v1144_v43, %s1360_s12 }
 0xb4b   :  { %v1110_v47 = vpop.f32.mrf.mxu1 }
 0xb4c   :  { %v1140_v49 = vadd.f32 %v1139_v44, %v1110_v47 }
 0xb4e   :  { %v1145_v50 = vadd.f32 %v1143_v48, %v1140_v49 }
 0xb50   :  { %1147 = vst.msk [vmem:[%s1683_s2 + $0x8] sm:$0xff] %vm59_vm0, %v1145_v50  ;;  %1152 = vrot.lane.b32.xlu1 %v1145_v50, %s1353_s5 }
 0xb58   :  { %1160 = vrot.lane.b32.xlu1 %v1145_v50, %s1352_s0 }
 0xb60   :  { %1168 = vrot.lane.b32.xlu1 %v1145_v50, %s1360_s12 }
 0xb8b   :  { %v1151_v52 = vpop.permute.xlu2 %1150 }
 0xb8c   :  { %1156 = vst.msk [vmem:[%s1683_s2 + $0x10] sm:$0xff] %vm59_vm0, %v1151_v52 }
 0xb93   :  { %v1159_v53 = vpop.permute.xlu2 %1158 }
 0xb94   :  { %1164 = vst.msk [vmem:[%s1683_s2 + $0x20] sm:$0xff] %vm59_vm0, %v1159_v53 }
 0xb9b   :  { %v1167_v25 = vpop.permute.xlu2 %1166 }
 0xb9c   :  { %1172 = vst.msk [vmem:[%s1683_s2 + $0x30] sm:$0xff] %vm59_vm0, %v1167_v25 }
 0xbc2   :  { %v1153_v29 = vpop.permute.xlu1 %1152 }
 0xbc3   :  { %1157 = vst.msk [vmem:[%s1683_s2 + $0x18] sm:$0xff] %vm59_vm0, %v1153_v29 }
 0xbca   :  { %v1161_v32 = vpop.permute.xlu1 %1160 }
 0xbcb   :  { %1165 = vst.msk [vmem:[%s1683_s2 + $0x28] sm:$0xff] %vm59_vm0, %v1161_v32 }
 0xbd2   :  { %v1169_v54 = vpop.permute.xlu1 %1168 }
 0xbd3   :  { %1173 = vst.msk [vmem:[%s1683_s2 + $0x38] sm:$0xff] %vm59_vm0, %v1169_v54 }
 0xbd4   :  { %1178 = vsyncpa [#allocation4], 1 }

</bundles_post_ra>
